<compile_context>
chip_gen: v7x
topology: tpu7x:2x2x1
jax: 0.10.0
libtpu: 0.0.40
codegen_flags: <defaults>
</compile_context>

<pallas_src>
import functools
import math

import jax
import jax.numpy as jnp
from jax.experimental import pallas as pl
from jax.experimental.pallas import tpu as pltpu


_WEIGHT_NAMES = ("emb_ln_g", "emb_ln_b",
                 "wqkv", "bqkv", "wo", "bo", "ln1_g", "ln1_b",
                 "w1", "b1", "w2", "b2", "ln2_g", "ln2_b",
                 "cls_w", "cls_b")
_LAYER_NAMES = {"wqkv", "bqkv", "wo", "bo", "ln1_g", "ln1_b",
                "w1", "b1", "w2", "b2", "ln2_g", "ln2_b"}


# ---------------------------------------------------------------------------
# Fused encoder kernel (one grid step = one (batch row, layer) pair)
# ---------------------------------------------------------------------------

def _pos_encoder_kernel(*refs, n_heads, num_tags, with_loss, eps=1e-5):
  (x_ref, bias_ref,
   emb_g_ref, emb_b_ref,
   wqkv_ref, bqkv_ref, wo_ref, bo_ref, ln1g_ref, ln1b_ref,
   w1_ref, b1_ref, w2_ref, b2_ref, ln2g_ref, ln2b_ref,
   clsw_ref, clsb_ref) = refs[:18]
  if with_loss:
    labels_ref, out_ref, h_ref = refs[18], refs[19], refs[20]
  else:
    labels_ref, out_ref, h_ref = None, refs[18], refs[19]

  layer = pl.program_id(1)
  n_layers = pl.num_programs(1)
  S, H = x_ref.shape
  Dh = H // n_heads
  scale = jnp.float32(1.0 / math.sqrt(Dh))
  f32, bf16 = jnp.float32, jnp.bfloat16

  def ln(v, g, b):
    mu = jnp.mean(v, axis=-1, keepdims=True)
    var = jnp.mean(jnp.square(v - mu), axis=-1, keepdims=True)
    return (v - mu) * jax.lax.rsqrt(var + eps) * g + b

  def gelu(v):
    # TODO(synk): HF xlm-roberta uses erf-GELU; tanh approximation used here.
    c = jnp.float32(0.7978845608028654)
    return 0.5 * v * (1.0 + jnp.tanh(c * (v + 0.044715 * v * v * v)))

  # Residual stream persists in VMEM scratch across the layer grid axis.
  @pl.when(layer == 0)
  def _():
    h_ref[...] = ln(x_ref[...].astype(f32), emb_g_ref[...], emb_b_ref[...])

  h = h_ref[...]
  bias = bias_ref[...].astype(f32)                         # [1, S] key mask

  # ---- self-attention: fused QKV matmul (bf16 weights, f32 accumulate) ----
  qkv = jnp.dot(h.astype(bf16), wqkv_ref[...],
                preferred_element_type=f32) + bqkv_ref[...]
  q = qkv[:, 0:H] * scale                                  # fold 1/sqrt(Dh)
  k = qkv[:, H:2 * H]
  v = qkv[:, 2 * H:3 * H]

  # Per-head attention stays in registers.  Instead of assembling a context
  # slab, each head's (p @ v) is projected through the matching row-block of
  # W_o and accumulated — identical to concat(ctx_heads) @ W_o, but with no
  # VMEM scratch, no masked sub-lane stores and no store->load round-trip.
  # TODO(synk): at Dh=64 use a head-major qkv layout so the head slices below
  #   are lane-aligned; at toy Dh=8 they are unavoidable narrow value slices.
  attn = None
  for hd in range(n_heads):
    c0 = hd * Dh
    qh = q[:, c0:c0 + Dh]
    kh = k[:, c0:c0 + Dh]
    vh = v[:, c0:c0 + Dh]
    s = jax.lax.dot_general(qh, kh, (((1,), (1,)), ((), ())),
                            preferred_element_type=f32) + bias      # [S, S]
    s = s - jnp.max(s, axis=-1, keepdims=True)
    p = jnp.exp(s)
    p = p * pl.reciprocal(jnp.sum(p, axis=-1, keepdims=True), approx=True)
    ctx_h = jnp.dot(p, vh, preferred_element_type=f32)              # [S, Dh]
    term = jnp.dot(ctx_h.astype(bf16), wo_ref[c0:c0 + Dh, :],
                   preferred_element_type=f32)                      # [S, H]
    attn = term if attn is None else attn + term
  attn = attn + bo_ref[...]
  h = ln(h + attn, ln1g_ref[...], ln1b_ref[...])                    # post-LN

  # ---- feed-forward ----
  ff = jnp.dot(h.astype(bf16), w1_ref[...],
               preferred_element_type=f32) + b1_ref[...]
  ff = gelu(ff)
  ff = jnp.dot(ff.astype(bf16), w2_ref[...],
               preferred_element_type=f32) + b2_ref[...]
  h = ln(h + ff, ln2g_ref[...], ln2b_ref[...])
  h_ref[...] = h

  # ---- classifier head (+ optional per-position CE) at the last layer ----
  @pl.when(layer == n_layers - 1)
  def _():
    # TODO(synk): Dropout(0.3) is identity at inference.
    logits = jnp.dot(h.astype(bf16), clsw_ref[...],
                     preferred_element_type=f32) + clsb_ref[...]    # [S, Tpad]
    col = jax.lax.broadcasted_iota(jnp.int32, logits.shape, 1)
    if with_loss:
      lab = labels_ref[...]                                         # [S, 1]
      xl = jnp.where(col < num_tags, logits, jnp.float32(-1e30))
      m = jnp.max(xl, axis=-1, keepdims=True)
      lse = jnp.log(jnp.sum(jnp.exp(xl - m), axis=-1, keepdims=True)) + m
      sel = jnp.sum(jnp.where(col == lab, xl, 0.0), axis=-1, keepdims=True)
      valid = (lab != -100).astype(f32)                             # [S, 1]
      nll = (lse - sel) * valid
      # Lane-dense slab: lane 0 = per-position nll, lane 1 = valid flag.
      out_ref[...] = jnp.where(col == 0, nll,
                               jnp.where(col == 1, valid, jnp.float32(0.0)))
    else:
      out_ref[...] = logits.astype(out_ref.dtype)


# ---------------------------------------------------------------------------
# pallas_call wrapper (one launch per forward)
# ---------------------------------------------------------------------------

def _forward_impl(cfg, params, input_ids, attention_mask, labels):
  B, S = input_ids.shape
  H, T, L = cfg["hidden"], cfg["num_tags"], cfg["n_layers"]
  M = B * S
  Tpad = params["cls_w"].shape[1]
  with_loss = labels is not None

  # Embedding gathers stay in plain JAX (data-dependent gather is glue);
  # everything downstream runs in the single Pallas kernel.
  x = jnp.take(params["word_emb"], input_ids, axis=0)               # [B, S, H]
  pos_ids = jnp.arange(S, dtype=jnp.int32) + 2                      # RoBERTa offset
  x = x + jnp.take(params["pos_emb"], pos_ids, axis=0)[None, :, :]
  x = x + params["type_emb"][0][None, None, :]
  x2 = x.reshape(M, H).astype(jnp.float32)

  # Additive key-mask bias, hoisted once per forward.
  bias = ((1.0 - attention_mask.astype(jnp.float32))
          * jnp.float32(-1e9)).reshape(B, 1, S)

  weights = [params[n] for n in _WEIGHT_NAMES]

  def shared_spec(arr):
    nd = arr.ndim
    return pl.BlockSpec(arr.shape, lambda b, l, _n=nd: (0,) * _n)

  def layer_spec(arr):
    # Leading (layer) dim squeezed; kernel sees a single layer's weight tile.
    return pl.BlockSpec((None,) + arr.shape[1:], lambda b, l: (l, 0, 0))

  weight_specs = [layer_spec(a) if n in _LAYER_NAMES else shared_spec(a)
                  for n, a in zip(_WEIGHT_NAMES, weights)]

  operands = [x2, bias] + weights
  in_specs = [
      pl.BlockSpec((S, H), lambda b, l: (b, 0)),
      pl.BlockSpec((None, 1, S), lambda b, l: (b, 0, 0)),
  ] + weight_specs
  if with_loss:
    labels3 = labels.reshape(B, S, 1).astype(jnp.int32)
    operands.append(labels3)
    in_specs.append(pl.BlockSpec((None, S, 1), lambda b, l: (b, 0, 0)))

  out_shape = jax.ShapeDtypeStruct((M, Tpad), jnp.float32)
  out_spec = pl.BlockSpec((S, Tpad), lambda b, l: (b, 0))

  # Explicit VMEM budget from actual block/scratch sizes (double-buffered).
  block_bytes = 2 * (S * H * 4) + 2 * (S * 4) + 2 * (S * Tpad * 4)
  for n, a in zip(_WEIGHT_NAMES, weights):
    blk = (a.size * a.dtype.itemsize) // (L if n in _LAYER_NAMES else 1)
    block_bytes += 2 * blk
  if with_loss:
    block_bytes += 2 * (S * 4)
  block_bytes += S * H * 4                                          # h scratch
  vmem_limit = min(max(2 * block_bytes + (4 << 20), 32 << 20), 64 << 20)

  kernel = functools.partial(
      _pos_encoder_kernel,
      n_heads=cfg["heads"], num_tags=T, with_loss=with_loss)

  out = pl.pallas_call(
      kernel,
      out_shape=out_shape,
      grid=(B, L),
      in_specs=in_specs,
      out_specs=out_spec,
      scratch_shapes=[pltpu.VMEM((S, H), jnp.float32)],             # residual h
      compiler_params=pltpu.CompilerParams(
          dimension_semantics=("parallel", "arbitrary"),
          vmem_limit_bytes=vmem_limit),
  )(*operands)

  if with_loss:
    nll_sum = jnp.sum(out[:, 0])
    n_valid = jnp.sum(out[:, 1])
    # Guard against an all-ignored batch (would otherwise be 0/0 -> NaN).
    return nll_sum / jnp.maximum(n_valid, 1.0)
  return out[:, :T].reshape(B, S, T)


def build_forward(cfg):
  """Returns forward(params, input_ids, attention_mask, labels=None)."""
  fwd_logits = jax.jit(functools.partial(_forward_impl, cfg, labels=None))
  fwd_loss = jax.jit(functools.partial(_forward_impl, cfg))

  def forward(params, input_ids, attention_mask, labels=None):
    if labels is None:
      return fwd_logits(params, input_ids, attention_mask)
    return fwd_loss(params, input_ids, attention_mask, labels)

  return forward


# ---------------------------------------------------------------------------
# Parameters (synthetic, deterministic); matrices stored in bf16
# ---------------------------------------------------------------------------

def _round_up(x, m):
  return ((x + m - 1) // m) * m


def init_params(key, cfg):
  V, P, H = cfg["vocab"], cfg["max_pos"], cfg["hidden"]
  I, L, T = cfg["inter"], cfg["n_layers"], cfg["num_tags"]
  Tpad = _round_up(T, 128)
  keys = jax.random.split(key, 8)
  bf16 = jnp.bfloat16

  def w(k, shape, dtype=jnp.float32):
    return (0.02 * jax.random.normal(k, shape)).astype(dtype)

  cls_w = jnp.zeros((H, Tpad), jnp.float32).at[:, :T].set(
      0.02 * jax.random.normal(keys[7], (H, T))).astype(bf16)

  return {
      "word_emb": w(keys[0], (V, H)),
      "pos_emb": w(keys[1], (P, H)),
      "type_emb": w(keys[2], (1, H)),
      "emb_ln_g": jnp.ones((1, H), jnp.float32),
      "emb_ln_b": jnp.zeros((1, H), jnp.float32),
      "wqkv": w(keys[3], (L, H, 3 * H), bf16),
      "bqkv": jnp.zeros((L, 1, 3 * H), jnp.float32),
      "wo": w(keys[4], (L, H, H), bf16),
      "bo": jnp.zeros((L, 1, H), jnp.float32),
      "ln1_g": jnp.ones((L, 1, H), jnp.float32),
      "ln1_b": jnp.zeros((L, 1, H), jnp.float32),
      "w1": w(keys[5], (L, H, I), bf16),
      "b1": jnp.zeros((L, 1, I), jnp.float32),
      "w2": w(keys[6], (L, I, H), bf16),
      "b2": jnp.zeros((L, 1, H), jnp.float32),
      "ln2_g": jnp.ones((L, 1, H), jnp.float32),
      "ln2_b": jnp.zeros((L, 1, H), jnp.float32),
      "cls_w": cls_w,
      "cls_b": jnp.zeros((1, Tpad), jnp.float32),
  }


# ---------------------------------------------------------------------------
# Pure-JAX reference (loose sanity check of kernel semantics)
# ---------------------------------------------------------------------------

def _reference_forward(cfg, params, input_ids, attention_mask, labels=None):
  B, S = input_ids.shape
  H, nH, L, T = cfg["hidden"], cfg["heads"], cfg["n_layers"], cfg["num_tags"]
  Dh = H // nH

  def ln(v, g, b):
    mu = v.mean(-1, keepdims=True)
    var = ((v - mu) ** 2).mean(-1, keepdims=True)
    return (v - mu) * jax.lax.rsqrt(var + 1e-5) * g + b

  def gelu(v):
    c = 0.7978845608028654
    return 0.5 * v * (1.0 + jnp.tanh(c * (v + 0.044715 * v ** 3)))

  x = jnp.take(params["word_emb"], input_ids, axis=0)
  x = x + jnp.take(params["pos_emb"], jnp.arange(S, dtype=jnp.int32) + 2,
                   axis=0)[None]
  x = x + params["type_emb"][0][None, None, :]
  h = ln(x.reshape(B * S, H), params["emb_ln_g"], params["emb_ln_b"])
  bias = (1.0 - attention_mask.astype(jnp.float32)) * -1e9

  for l in range(L):
    qkv = h @ params["wqkv"][l] + params["bqkv"][l]
    q, k, v = jnp.split(qkv, 3, axis=-1)
    q = q.reshape(B, S, nH, Dh).transpose(0, 2, 1, 3) / math.sqrt(Dh)
    k = k.reshape(B, S, nH, Dh).transpose(0, 2, 1, 3)
    v = v.reshape(B, S, nH, Dh).transpose(0, 2, 1, 3)
    s = jnp.einsum("bhqd,bhkd->bhqk", q, k) + bias[:, None, None, :]
    p = jax.nn.softmax(s, axis=-1)
    ctx = jnp.einsum("bhqk,bhkd->bhqd", p, v).transpose(0, 2, 1, 3)
    ctx = ctx.reshape(B * S, H)
    h = ln(h + ctx @ params["wo"][l] + params["bo"][l],
           params["ln1_g"][l], params["ln1_b"][l])
    ff = gelu(h @ params["w1"][l] + params["b1"][l]) @ params["w2"][l]
    ff = ff + params["b2"][l]
    h = ln(h + ff, params["ln2_g"][l], params["ln2_b"][l])

  logits = h @ params["cls_w"][:, :T] + params["cls_b"][:, :T]
  if labels is None:
    return logits.reshape(B, S, T)
  lab = labels.reshape(-1)
  valid = (lab != -100)
  logp = jax.nn.log_softmax(logits, axis=-1)
  nll = -jnp.take_along_axis(logp, jnp.where(valid, lab, 0)[:, None],
                             axis=-1)[:, 0]
  return jnp.sum(nll * valid) / jnp.sum(valid)


# ---------------------------------------------------------------------------
# Main
# ---------------------------------------------------------------------------

if __name__ == "__main__":
  key = jax.random.PRNGKey(0)
  k_param, k_ids, k_lab = jax.random.split(key, 3)

  cfg = dict(vocab=64, max_pos=64, hidden=32, heads=4, inter=64,
             n_layers=2, num_tags=8)
  B, S = 2, 8

  params = init_params(k_param, cfg)
  forward = build_forward(cfg)

  input_ids = jax.random.randint(k_ids, (B, S), 0, cfg["vocab"], dtype=jnp.int32)
  attention_mask = jnp.ones((B, S), dtype=jnp.int32).at[:, -2:].set(0)
  labels = jax.random.randint(k_lab, (B, S), 0, cfg["num_tags"], dtype=jnp.int32)
  labels = labels.at[:, -2:].set(-100)   # ignore padded positions

  logits = forward(params, input_ids, attention_mask)
  loss = forward(params, input_ids, attention_mask, labels=labels)
  jax.block_until_ready(logits)
  jax.block_until_ready(loss)

  assert logits.shape == (B, S, cfg["num_tags"])
  assert loss.shape == ()

  # Loose sanity check against a pure-JAX reference (loose tolerance to stay
  # robust to bf16 weights / MXU / EUP precision differences while catching
  # structural bugs).
  ref_logits = _reference_forward(cfg, params, input_ids, attention_mask)
  ref_loss = _reference_forward(cfg, params, input_ids, attention_mask, labels)
  assert float(jnp.max(jnp.abs(logits - ref_logits))) < 5e-2
  assert abs(float(loss) - float(ref_loss)) < 5e-2
  assert bool(jnp.isfinite(loss))

  print("KERNEL_OK")
</pallas_src>

<mosaic_0001>
module attributes {stable_mosaic.version = 11 : i64} {
  func.func @_pos_encoder_kernel(%arg0: i32, %arg1: i32, %arg2: memref<8x32xf32, #tpu.memory_space<vmem>>, %arg3: memref<1x1x8xf32, #tpu.memory_space<vmem>>, %arg4: memref<1x32xf32, #tpu.memory_space<vmem>>, %arg5: memref<1x32xf32, #tpu.memory_space<vmem>>, %arg6: memref<1x32x96xbf16, #tpu.memory_space<vmem>>, %arg7: memref<1x1x96xf32, #tpu.memory_space<vmem>>, %arg8: memref<1x32x32xbf16, #tpu.memory_space<vmem>>, %arg9: memref<1x1x32xf32, #tpu.memory_space<vmem>>, %arg10: memref<1x1x32xf32, #tpu.memory_space<vmem>>, %arg11: memref<1x1x32xf32, #tpu.memory_space<vmem>>, %arg12: memref<1x32x64xbf16, #tpu.memory_space<vmem>>, %arg13: memref<1x1x64xf32, #tpu.memory_space<vmem>>, %arg14: memref<1x64x32xbf16, #tpu.memory_space<vmem>>, %arg15: memref<1x1x32xf32, #tpu.memory_space<vmem>>, %arg16: memref<1x1x32xf32, #tpu.memory_space<vmem>>, %arg17: memref<1x1x32xf32, #tpu.memory_space<vmem>>, %arg18: memref<32x128xbf16, #tpu.memory_space<vmem>>, %arg19: memref<1x128xf32, #tpu.memory_space<vmem>>, %arg20: memref<8x128xf32, #tpu.memory_space<vmem>>, %arg21: memref<8x32xf32, #tpu.memory_space<vmem>>) attributes {dimension_semantics = [#tpu.dimension_semantics<parallel>, #tpu.dimension_semantics<arbitrary>], iteration_bounds = array<i64: 2, 2>, scalar_prefetch = 0 : i64, scratch_operands = 1 : i64, tpu.core_type = #tpu.core_type<tc>, window_params = [{transform_indices = @transform_0, window_bounds = array<i64: 8, 32>}, {transform_indices = @transform_1, window_bounds = array<i64: 1, 1, 8>}, {pipeline_mode = #tpu.pipeline_mode<synchronous>, transform_indices = @transform_2, window_bounds = array<i64: 1, 32>}, {pipeline_mode = #tpu.pipeline_mode<synchronous>, transform_indices = @transform_3, window_bounds = array<i64: 1, 32>}, {transform_indices = @transform_4, window_bounds = array<i64: 1, 32, 96>}, {transform_indices = @transform_5, window_bounds = array<i64: 1, 1, 96>}, {transform_indices = @transform_6, window_bounds = array<i64: 1, 32, 32>}, {transform_indices = @transform_7, window_bounds = array<i64: 1, 1, 32>}, {transform_indices = @transform_8, window_bounds = array<i64: 1, 1, 32>}, {transform_indices = @transform_9, window_bounds = array<i64: 1, 1, 32>}, {transform_indices = @transform_10, window_bounds = array<i64: 1, 32, 64>}, {transform_indices = @transform_11, window_bounds = array<i64: 1, 1, 64>}, {transform_indices = @transform_12, window_bounds = array<i64: 1, 64, 32>}, {transform_indices = @transform_13, window_bounds = array<i64: 1, 1, 32>}, {transform_indices = @transform_14, window_bounds = array<i64: 1, 1, 32>}, {transform_indices = @transform_15, window_bounds = array<i64: 1, 1, 32>}, {pipeline_mode = #tpu.pipeline_mode<synchronous>, transform_indices = @transform_16, window_bounds = array<i64: 32, 128>}, {pipeline_mode = #tpu.pipeline_mode<synchronous>, transform_indices = @transform_17, window_bounds = array<i64: 1, 128>}, {transform_indices = @transform_18, window_bounds = array<i64: 8, 128>}]} {
    %c0_i32 = arith.constant 0 : i32
    %0 = arith.cmpi eq, %arg1, %c0_i32 : i32
    %1 = arith.extui %0 : i1 to i32
    %c0_i32_0 = arith.constant 0 : i32
    %2 = arith.cmpi ne, %1, %c0_i32_0 : i32
    scf.if %2 {
      %c0_87 = arith.constant 0 : index
      %c0_88 = arith.constant 0 : index
      %197 = vector.load %arg2[%c0_87, %c0_88] : memref<8x32xf32, #tpu.memory_space<vmem>>, vector<8x32xf32>
      %c0_89 = arith.constant 0 : index
      %c0_90 = arith.constant 0 : index
      %198 = vector.load %arg4[%c0_89, %c0_90] : memref<1x32xf32, #tpu.memory_space<vmem>>, vector<1x32xf32>
      %c0_91 = arith.constant 0 : index
      %c0_92 = arith.constant 0 : index
      %199 = vector.load %arg5[%c0_91, %c0_92] : memref<1x32xf32, #tpu.memory_space<vmem>>, vector<1x32xf32>
      %cst_93 = arith.constant dense<0.000000e+00> : vector<8xf32>
      %200 = vector.multi_reduction <add>, %197, %cst_93 [1] : vector<8x32xf32> to vector<8xf32>
      %201 = vector.shape_cast %200 : vector<8xf32> to vector<8x1xf32>
      %cst_94 = arith.constant 3.200000e+01 : f32
      %202 = vector.broadcast %cst_94 : f32 to vector<8x1xf32>
      %203 = arith.divf %201, %202 : vector<8x1xf32>
      %204 = vector.broadcast %203 : vector<8x1xf32> to vector<8x32xf32>
      %205 = arith.subf %197, %204 : vector<8x32xf32>
      %206 = arith.mulf %205, %205 : vector<8x32xf32>
      %cst_95 = arith.constant dense<0.000000e+00> : vector<8xf32>
      %207 = vector.multi_reduction <add>, %206, %cst_95 [1] : vector<8x32xf32> to vector<8xf32>
      %208 = vector.shape_cast %207 : vector<8xf32> to vector<8x1xf32>
      %cst_96 = arith.constant 3.200000e+01 : f32
      %209 = vector.broadcast %cst_96 : f32 to vector<8x1xf32>
      %210 = arith.divf %208, %209 : vector<8x1xf32>
      %211 = vector.broadcast %203 : vector<8x1xf32> to vector<8x32xf32>
      %212 = arith.subf %197, %211 : vector<8x32xf32>
      %cst_97 = arith.constant 9.99999974E-6 : f32
      %213 = vector.broadcast %cst_97 : f32 to vector<8x1xf32>
      %214 = arith.addf %210, %213 : vector<8x1xf32>
      %215 = math.rsqrt %214 : vector<8x1xf32>
      %216 = vector.broadcast %215 : vector<8x1xf32> to vector<8x32xf32>
      %217 = arith.mulf %212, %216 : vector<8x32xf32>
      %218 = vector.broadcast %198 : vector<1x32xf32> to vector<8x32xf32>
      %219 = arith.mulf %217, %218 : vector<8x32xf32>
      %220 = vector.broadcast %199 : vector<1x32xf32> to vector<8x32xf32>
      %221 = arith.addf %219, %220 : vector<8x32xf32>
      %c0_98 = arith.constant 0 : index
      %c0_99 = arith.constant 0 : index
      %222 = vector.load %arg21[%c0_98, %c0_99] : memref<8x32xf32, #tpu.memory_space<vmem>>, vector<8x32xf32>
      tpu.vector_store %arg21[%c0_98, %c0_99], %221 {strides = array<i32>} : memref<8x32xf32, #tpu.memory_space<vmem>>, vector<8x32xf32>,
    } else {
    }
    %c0 = arith.constant 0 : index
    %c0_1 = arith.constant 0 : index
    %3 = vector.load %arg21[%c0, %c0_1] : memref<8x32xf32, #tpu.memory_space<vmem>>, vector<8x32xf32>
    %c0_2 = arith.constant 0 : index
    %c0_3 = arith.constant 0 : index
    %c0_4 = arith.constant 0 : index
    %4 = vector.load %arg3[%c0_2, %c0_3, %c0_4] : memref<1x1x8xf32, #tpu.memory_space<vmem>>, vector<1x1x8xf32>
    %5 = vector.shape_cast %4 : vector<1x1x8xf32> to vector<1x8xf32>
    %6 = arith.truncf %3 : vector<8x32xf32> to vector<8x32xbf16>
    %c0_5 = arith.constant 0 : index
    %c0_6 = arith.constant 0 : index
    %c0_7 = arith.constant 0 : index
    %7 = vector.load %arg6[%c0_5, %c0_6, %c0_7] : memref<1x32x96xbf16, #tpu.memory_space<vmem>>, vector<1x32x96xbf16>
    %8 = vector.shape_cast %7 : vector<1x32x96xbf16> to vector<32x96xbf16>
    %cst = arith.constant dense<0.000000e+00> : vector<8x96xf32>
    %9 = tpu.matmul %6, %8, %cst {dimension_numbers = #tpu.dot_dimension_numbers<[1], [0], [0], [1], [0, 0, 1, 1], [], []>} : vector<8x32xbf16>, vector<32x96xbf16>, vector<8x96xf32> -> vector<8x96xf32>
    %c0_8 = arith.constant 0 : index
    %c0_9 = arith.constant 0 : index
    %c0_10 = arith.constant 0 : index
    %10 = vector.load %arg7[%c0_8, %c0_9, %c0_10] : memref<1x1x96xf32, #tpu.memory_space<vmem>>, vector<1x1x96xf32>
    %11 = vector.shape_cast %10 : vector<1x1x96xf32> to vector<1x96xf32>
    %12 = vector.broadcast %11 : vector<1x96xf32> to vector<8x96xf32>
    %13 = arith.addf %9, %12 : vector<8x96xf32>
    %14 = vector.extract_strided_slice %13 {offsets = [0, 0], sizes = [8, 32], strides = [1, 1]} : vector<8x96xf32> to vector<8x32xf32>
    %cst_11 = arith.constant 0.353553385 : f32
    %15 = vector.broadcast %cst_11 : f32 to vector<8x32xf32>
    %16 = arith.mulf %14, %15 : vector<8x32xf32>
    %17 = vector.extract_strided_slice %13 {offsets = [0, 32], sizes = [8, 32], strides = [1, 1]} : vector<8x96xf32> to vector<8x32xf32>
    %18 = vector.extract_strided_slice %13 {offsets = [0, 64], sizes = [8, 32], strides = [1, 1]} : vector<8x96xf32> to vector<8x32xf32>
    %19 = vector.extract_strided_slice %16 {offsets = [0, 0], sizes = [8, 8], strides = [1, 1]} : vector<8x32xf32> to vector<8x8xf32>
    %20 = vector.extract_strided_slice %17 {offsets = [0, 0], sizes = [8, 8], strides = [1, 1]} : vector<8x32xf32> to vector<8x8xf32>
    %21 = vector.extract_strided_slice %18 {offsets = [0, 0], sizes = [8, 8], strides = [1, 1]} : vector<8x32xf32> to vector<8x8xf32>
    %cst_12 = arith.constant dense<0.000000e+00> : vector<8x8xf32>
    %22 = tpu.matmul %19, %20, %cst_12 {dimension_numbers = #tpu.dot_dimension_numbers<[1], [1], [0], [0], [0, 0, 1, 0], [], []>} : vector<8x8xf32>, vector<8x8xf32>, vector<8x8xf32> -> vector<8x8xf32>
    %23 = vector.broadcast %5 : vector<1x8xf32> to vector<8x8xf32>
    %24 = arith.addf %22, %23 : vector<8x8xf32>
    %cst_13 = arith.constant dense<0xFF800000> : vector<8xf32>
    %25 = vector.multi_reduction <maximumf>, %24, %cst_13 [1] : vector<8x8xf32> to vector<8xf32>
    %26 = vector.shape_cast %25 : vector<8xf32> to vector<8x1xf32>
    %27 = vector.broadcast %26 : vector<8x1xf32> to vector<8x8xf32>
    %28 = arith.subf %24, %27 : vector<8x8xf32>
    %29 = math.exp %28 : vector<8x8xf32>
    %cst_14 = arith.constant dense<0.000000e+00> : vector<8xf32>
    %30 = vector.multi_reduction <add>, %29, %cst_14 [1] : vector<8x8xf32> to vector<8xf32>
    %31 = vector.shape_cast %30 : vector<8xf32> to vector<8x1xf32>
    %32 = tpu.reciprocal %31 {approx = true} : vector<8x1xf32> -> vector<8x1xf32>
    %33 = vector.broadcast %32 : vector<8x1xf32> to vector<8x8xf32>
    %34 = arith.mulf %29, %33 : vector<8x8xf32>
    %cst_15 = arith.constant dense<0.000000e+00> : vector<8x8xf32>
    %35 = tpu.matmul %34, %21, %cst_15 {dimension_numbers = #tpu.dot_dimension_numbers<[1], [0], [0], [1], [0, 0, 1, 1], [], []>} : vector<8x8xf32>, vector<8x8xf32>, vector<8x8xf32> -> vector<8x8xf32>
    %36 = arith.truncf %35 : vector<8x8xf32> to vector<8x8xbf16>
    %c0_16 = arith.constant 0 : index
    %c0_17 = arith.constant 0 : index
    %c0_18 = arith.constant 0 : index
    %37 = vector.load %arg8[%c0_16, %c0_17, %c0_18] : memref<1x32x32xbf16, #tpu.memory_space<vmem>>, vector<1x8x32xbf16>
    %38 = vector.shape_cast %37 : vector<1x8x32xbf16> to vector<8x32xbf16>
    %cst_19 = arith.constant dense<0.000000e+00> : vector<8x32xf32>
    %39 = tpu.matmul %36, %38, %cst_19 {dimension_numbers = #tpu.dot_dimension_numbers<[1], [0], [0], [1], [0, 0, 1, 1], [], []>} : vector<8x8xbf16>, vector<8x32xbf16>, vector<8x32xf32> -> vector<8x32xf32>
    %40 = vector.extract_strided_slice %16 {offsets = [0, 8], sizes = [8, 8], strides = [1, 1]} : vector<8x32xf32> to vector<8x8xf32>
    %41 = vector.extract_strided_slice %17 {offsets = [0, 8], sizes = [8, 8], strides = [1, 1]} : vector<8x32xf32> to vector<8x8xf32>
    %42 = vector.extract_strided_slice %18 {offsets = [0, 8], sizes = [8, 8], strides = [1, 1]} : vector<8x32xf32> to vector<8x8xf32>
    %cst_20 = arith.constant dense<0.000000e+00> : vector<8x8xf32>
    %43 = tpu.matmul %40, %41, %cst_20 {dimension_numbers = #tpu.dot_dimension_numbers<[1], [1], [0], [0], [0, 0, 1, 0], [], []>} : vector<8x8xf32>, vector<8x8xf32>, vector<8x8xf32> -> vector<8x8xf32>
    %44 = vector.broadcast %5 : vector<1x8xf32> to vector<8x8xf32>
    %45 = arith.addf %43, %44 : vector<8x8xf32>
    %cst_21 = arith.constant dense<0xFF800000> : vector<8xf32>
    %46 = vector.multi_reduction <maximumf>, %45, %cst_21 [1] : vector<8x8xf32> to vector<8xf32>
    %47 = vector.shape_cast %46 : vector<8xf32> to vector<8x1xf32>
    %48 = vector.broadcast %47 : vector<8x1xf32> to vector<8x8xf32>
    %49 = arith.subf %45, %48 : vector<8x8xf32>
    %50 = math.exp %49 : vector<8x8xf32>
    %cst_22 = arith.constant dense<0.000000e+00> : vector<8xf32>
    %51 = vector.multi_reduction <add>, %50, %cst_22 [1] : vector<8x8xf32> to vector<8xf32>
    %52 = vector.shape_cast %51 : vector<8xf32> to vector<8x1xf32>
    %53 = tpu.reciprocal %52 {approx = true} : vector<8x1xf32> -> vector<8x1xf32>
    %54 = vector.broadcast %53 : vector<8x1xf32> to vector<8x8xf32>
    %55 = arith.mulf %50, %54 : vector<8x8xf32>
    %cst_23 = arith.constant dense<0.000000e+00> : vector<8x8xf32>
    %56 = tpu.matmul %55, %42, %cst_23 {dimension_numbers = #tpu.dot_dimension_numbers<[1], [0], [0], [1], [0, 0, 1, 1], [], []>} : vector<8x8xf32>, vector<8x8xf32>, vector<8x8xf32> -> vector<8x8xf32>
    %57 = arith.truncf %56 : vector<8x8xf32> to vector<8x8xbf16>
    %c0_24 = arith.constant 0 : index
    %c8 = arith.constant 8 : index
    %c0_25 = arith.constant 0 : index
    %58 = vector.load %arg8[%c0_24, %c8, %c0_25] : memref<1x32x32xbf16, #tpu.memory_space<vmem>>, vector<1x8x32xbf16>
    %59 = vector.shape_cast %58 : vector<1x8x32xbf16> to vector<8x32xbf16>
    %cst_26 = arith.constant dense<0.000000e+00> : vector<8x32xf32>
    %60 = tpu.matmul %57, %59, %cst_26 {dimension_numbers = #tpu.dot_dimension_numbers<[1], [0], [0], [1], [0, 0, 1, 1], [], []>} : vector<8x8xbf16>, vector<8x32xbf16>, vector<8x32xf32> -> vector<8x32xf32>
    %61 = arith.addf %39, %60 : vector<8x32xf32>
    %62 = vector.extract_strided_slice %16 {offsets = [0, 16], sizes = [8, 8], strides = [1, 1]} : vector<8x32xf32> to vector<8x8xf32>
    %63 = vector.extract_strided_slice %17 {offsets = [0, 16], sizes = [8, 8], strides = [1, 1]} : vector<8x32xf32> to vector<8x8xf32>
    %64 = vector.extract_strided_slice %18 {offsets = [0, 16], sizes = [8, 8], strides = [1, 1]} : vector<8x32xf32> to vector<8x8xf32>
    %cst_27 = arith.constant dense<0.000000e+00> : vector<8x8xf32>
    %65 = tpu.matmul %62, %63, %cst_27 {dimension_numbers = #tpu.dot_dimension_numbers<[1], [1], [0], [0], [0, 0, 1, 0], [], []>} : vector<8x8xf32>, vector<8x8xf32>, vector<8x8xf32> -> vector<8x8xf32>
    %66 = vector.broadcast %5 : vector<1x8xf32> to vector<8x8xf32>
    %67 = arith.addf %65, %66 : vector<8x8xf32>
    %cst_28 = arith.constant dense<0xFF800000> : vector<8xf32>
    %68 = vector.multi_reduction <maximumf>, %67, %cst_28 [1] : vector<8x8xf32> to vector<8xf32>
    %69 = vector.shape_cast %68 : vector<8xf32> to vector<8x1xf32>
    %70 = vector.broadcast %69 : vector<8x1xf32> to vector<8x8xf32>
    %71 = arith.subf %67, %70 : vector<8x8xf32>
    %72 = math.exp %71 : vector<8x8xf32>
    %cst_29 = arith.constant dense<0.000000e+00> : vector<8xf32>
    %73 = vector.multi_reduction <add>, %72, %cst_29 [1] : vector<8x8xf32> to vector<8xf32>
    %74 = vector.shape_cast %73 : vector<8xf32> to vector<8x1xf32>
    %75 = tpu.reciprocal %74 {approx = true} : vector<8x1xf32> -> vector<8x1xf32>
    %76 = vector.broadcast %75 : vector<8x1xf32> to vector<8x8xf32>
    %77 = arith.mulf %72, %76 : vector<8x8xf32>
    %cst_30 = arith.constant dense<0.000000e+00> : vector<8x8xf32>
    %78 = tpu.matmul %77, %64, %cst_30 {dimension_numbers = #tpu.dot_dimension_numbers<[1], [0], [0], [1], [0, 0, 1, 1], [], []>} : vector<8x8xf32>, vector<8x8xf32>, vector<8x8xf32> -> vector<8x8xf32>
    %79 = arith.truncf %78 : vector<8x8xf32> to vector<8x8xbf16>
    %c0_31 = arith.constant 0 : index
    %c16 = arith.constant 16 : index
    %c0_32 = arith.constant 0 : index
    %80 = vector.load %arg8[%c0_31, %c16, %c0_32] : memref<1x32x32xbf16, #tpu.memory_space<vmem>>, vector<1x8x32xbf16>
    %81 = vector.shape_cast %80 : vector<1x8x32xbf16> to vector<8x32xbf16>
    %cst_33 = arith.constant dense<0.000000e+00> : vector<8x32xf32>
    %82 = tpu.matmul %79, %81, %cst_33 {dimension_numbers = #tpu.dot_dimension_numbers<[1], [0], [0], [1], [0, 0, 1, 1], [], []>} : vector<8x8xbf16>, vector<8x32xbf16>, vector<8x32xf32> -> vector<8x32xf32>
    %83 = arith.addf %61, %82 : vector<8x32xf32>
    %84 = vector.extract_strided_slice %16 {offsets = [0, 24], sizes = [8, 8], strides = [1, 1]} : vector<8x32xf32> to vector<8x8xf32>
    %85 = vector.extract_strided_slice %17 {offsets = [0, 24], sizes = [8, 8], strides = [1, 1]} : vector<8x32xf32> to vector<8x8xf32>
    %86 = vector.extract_strided_slice %18 {offsets = [0, 24], sizes = [8, 8], strides = [1, 1]} : vector<8x32xf32> to vector<8x8xf32>
    %cst_34 = arith.constant dense<0.000000e+00> : vector<8x8xf32>
    %87 = tpu.matmul %84, %85, %cst_34 {dimension_numbers = #tpu.dot_dimension_numbers<[1], [1], [0], [0], [0, 0, 1, 0], [], []>} : vector<8x8xf32>, vector<8x8xf32>, vector<8x8xf32> -> vector<8x8xf32>
    %88 = vector.broadcast %5 : vector<1x8xf32> to vector<8x8xf32>
    %89 = arith.addf %87, %88 : vector<8x8xf32>
    %cst_35 = arith.constant dense<0xFF800000> : vector<8xf32>
    %90 = vector.multi_reduction <maximumf>, %89, %cst_35 [1] : vector<8x8xf32> to vector<8xf32>
    %91 = vector.shape_cast %90 : vector<8xf32> to vector<8x1xf32>
    %92 = vector.broadcast %91 : vector<8x1xf32> to vector<8x8xf32>
    %93 = arith.subf %89, %92 : vector<8x8xf32>
    %94 = math.exp %93 : vector<8x8xf32>
    %cst_36 = arith.constant dense<0.000000e+00> : vector<8xf32>
    %95 = vector.multi_reduction <add>, %94, %cst_36 [1] : vector<8x8xf32> to vector<8xf32>
    %96 = vector.shape_cast %95 : vector<8xf32> to vector<8x1xf32>
    %97 = tpu.reciprocal %96 {approx = true} : vector<8x1xf32> -> vector<8x1xf32>
    %98 = vector.broadcast %97 : vector<8x1xf32> to vector<8x8xf32>
    %99 = arith.mulf %94, %98 : vector<8x8xf32>
    %cst_37 = arith.constant dense<0.000000e+00> : vector<8x8xf32>
    %100 = tpu.matmul %99, %86, %cst_37 {dimension_numbers = #tpu.dot_dimension_numbers<[1], [0], [0], [1], [0, 0, 1, 1], [], []>} : vector<8x8xf32>, vector<8x8xf32>, vector<8x8xf32> -> vector<8x8xf32>
    %101 = arith.truncf %100 : vector<8x8xf32> to vector<8x8xbf16>
    %c0_38 = arith.constant 0 : index
    %c24 = arith.constant 24 : index
    %c0_39 = arith.constant 0 : index
    %102 = vector.load %arg8[%c0_38, %c24, %c0_39] : memref<1x32x32xbf16, #tpu.memory_space<vmem>>, vector<1x8x32xbf16>
    %103 = vector.shape_cast %102 : vector<1x8x32xbf16> to vector<8x32xbf16>
    %cst_40 = arith.constant dense<0.000000e+00> : vector<8x32xf32>
    %104 = tpu.matmul %101, %103, %cst_40 {dimension_numbers = #tpu.dot_dimension_numbers<[1], [0], [0], [1], [0, 0, 1, 1], [], []>} : vector<8x8xbf16>, vector<8x32xbf16>, vector<8x32xf32> -> vector<8x32xf32>
    %105 = arith.addf %83, %104 : vector<8x32xf32>
    %c0_41 = arith.constant 0 : index
    %c0_42 = arith.constant 0 : index
    %c0_43 = arith.constant 0 : index
    %106 = vector.load %arg9[%c0_41, %c0_42, %c0_43] : memref<1x1x32xf32, #tpu.memory_space<vmem>>, vector<1x1x32xf32>
    %107 = vector.shape_cast %106 : vector<1x1x32xf32> to vector<1x32xf32>
    %108 = vector.broadcast %107 : vector<1x32xf32> to vector<8x32xf32>
    %109 = arith.addf %105, %108 : vector<8x32xf32>
    %110 = arith.addf %3, %109 : vector<8x32xf32>
    %c0_44 = arith.constant 0 : index
    %c0_45 = arith.constant 0 : index
    %c0_46 = arith.constant 0 : index
    %111 = vector.load %arg10[%c0_44, %c0_45, %c0_46] : memref<1x1x32xf32, #tpu.memory_space<vmem>>, vector<1x1x32xf32>
    %112 = vector.shape_cast %111 : vector<1x1x32xf32> to vector<1x32xf32>
    %c0_47 = arith.constant 0 : index
    %c0_48 = arith.constant 0 : index
    %c0_49 = arith.constant 0 : index
    %113 = vector.load %arg11[%c0_47, %c0_48, %c0_49] : memref<1x1x32xf32, #tpu.memory_space<vmem>>, vector<1x1x32xf32>
    %114 = vector.shape_cast %113 : vector<1x1x32xf32> to vector<1x32xf32>
    %cst_50 = arith.constant dense<0.000000e+00> : vector<8xf32>
    %115 = vector.multi_reduction <add>, %110, %cst_50 [1] : vector<8x32xf32> to vector<8xf32>
    %116 = vector.shape_cast %115 : vector<8xf32> to vector<8x1xf32>
    %cst_51 = arith.constant 3.200000e+01 : f32
    %117 = vector.broadcast %cst_51 : f32 to vector<8x1xf32>
    %118 = arith.divf %116, %117 : vector<8x1xf32>
    %119 = vector.broadcast %118 : vector<8x1xf32> to vector<8x32xf32>
    %120 = arith.subf %110, %119 : vector<8x32xf32>
    %121 = arith.mulf %120, %120 : vector<8x32xf32>
    %cst_52 = arith.constant dense<0.000000e+00> : vector<8xf32>
    %122 = vector.multi_reduction <add>, %121, %cst_52 [1] : vector<8x32xf32> to vector<8xf32>
    %123 = vector.shape_cast %122 : vector<8xf32> to vector<8x1xf32>
    %cst_53 = arith.constant 3.200000e+01 : f32
    %124 = vector.broadcast %cst_53 : f32 to vector<8x1xf32>
    %125 = arith.divf %123, %124 : vector<8x1xf32>
    %126 = vector.broadcast %118 : vector<8x1xf32> to vector<8x32xf32>
    %127 = arith.subf %110, %126 : vector<8x32xf32>
    %cst_54 = arith.constant 9.99999974E-6 : f32
    %128 = vector.broadcast %cst_54 : f32 to vector<8x1xf32>
    %129 = arith.addf %125, %128 : vector<8x1xf32>
    %130 = math.rsqrt %129 : vector<8x1xf32>
    %131 = vector.broadcast %130 : vector<8x1xf32> to vector<8x32xf32>
    %132 = arith.mulf %127, %131 : vector<8x32xf32>
    %133 = vector.broadcast %112 : vector<1x32xf32> to vector<8x32xf32>
    %134 = arith.mulf %132, %133 : vector<8x32xf32>
    %135 = vector.broadcast %114 : vector<1x32xf32> to vector<8x32xf32>
    %136 = arith.addf %134, %135 : vector<8x32xf32>
    %137 = arith.truncf %136 : vector<8x32xf32> to vector<8x32xbf16>
    %c0_55 = arith.constant 0 : index
    %c0_56 = arith.constant 0 : index
    %c0_57 = arith.constant 0 : index
    %138 = vector.load %arg12[%c0_55, %c0_56, %c0_57] : memref<1x32x64xbf16, #tpu.memory_space<vmem>>, vector<1x32x64xbf16>
    %139 = vector.shape_cast %138 : vector<1x32x64xbf16> to vector<32x64xbf16>
    %cst_58 = arith.constant dense<0.000000e+00> : vector<8x64xf32>
    %140 = tpu.matmul %137, %139, %cst_58 {dimension_numbers = #tpu.dot_dimension_numbers<[1], [0], [0], [1], [0, 0, 1, 1], [], []>} : vector<8x32xbf16>, vector<32x64xbf16>, vector<8x64xf32> -> vector<8x64xf32>
    %c0_59 = arith.constant 0 : index
    %c0_60 = arith.constant 0 : index
    %c0_61 = arith.constant 0 : index
    %141 = vector.load %arg13[%c0_59, %c0_60, %c0_61] : memref<1x1x64xf32, #tpu.memory_space<vmem>>, vector<1x1x64xf32>
    %142 = vector.shape_cast %141 : vector<1x1x64xf32> to vector<1x64xf32>
    %143 = vector.broadcast %142 : vector<1x64xf32> to vector<8x64xf32>
    %144 = arith.addf %140, %143 : vector<8x64xf32>
    %cst_62 = arith.constant 5.000000e-01 : f32
    %145 = vector.broadcast %cst_62 : f32 to vector<8x64xf32>
    %146 = arith.mulf %145, %144 : vector<8x64xf32>
    %cst_63 = arith.constant 4.471500e-02 : f32
    %147 = vector.broadcast %cst_63 : f32 to vector<8x64xf32>
    %148 = arith.mulf %147, %144 : vector<8x64xf32>
    %149 = arith.mulf %148, %144 : vector<8x64xf32>
    %150 = arith.mulf %149, %144 : vector<8x64xf32>
    %151 = arith.addf %144, %150 : vector<8x64xf32>
    %cst_64 = arith.constant 0.797884583 : f32
    %152 = vector.broadcast %cst_64 : f32 to vector<8x64xf32>
    %153 = arith.mulf %152, %151 : vector<8x64xf32>
    %154 = math.tanh %153 : vector<8x64xf32>
    %cst_65 = arith.constant 1.000000e+00 : f32
    %155 = vector.broadcast %cst_65 : f32 to vector<8x64xf32>
    %156 = arith.addf %155, %154 : vector<8x64xf32>
    %157 = arith.mulf %146, %156 : vector<8x64xf32>
    %158 = arith.truncf %157 : vector<8x64xf32> to vector<8x64xbf16>
    %c0_66 = arith.constant 0 : index
    %c0_67 = arith.constant 0 : index
    %c0_68 = arith.constant 0 : index
    %159 = vector.load %arg14[%c0_66, %c0_67, %c0_68] : memref<1x64x32xbf16, #tpu.memory_space<vmem>>, vector<1x64x32xbf16>
    %160 = vector.shape_cast %159 : vector<1x64x32xbf16> to vector<64x32xbf16>
    %cst_69 = arith.constant dense<0.000000e+00> : vector<8x32xf32>
    %161 = tpu.matmul %158, %160, %cst_69 {dimension_numbers = #tpu.dot_dimension_numbers<[1], [0], [0], [1], [0, 0, 1, 1], [], []>} : vector<8x64xbf16>, vector<64x32xbf16>, vector<8x32xf32> -> vector<8x32xf32>
    %c0_70 = arith.constant 0 : index
    %c0_71 = arith.constant 0 : index
    %c0_72 = arith.constant 0 : index
    %162 = vector.load %arg15[%c0_70, %c0_71, %c0_72] : memref<1x1x32xf32, #tpu.memory_space<vmem>>, vector<1x1x32xf32>
    %163 = vector.shape_cast %162 : vector<1x1x32xf32> to vector<1x32xf32>
    %164 = vector.broadcast %163 : vector<1x32xf32> to vector<8x32xf32>
    %165 = arith.addf %161, %164 : vector<8x32xf32>
    %166 = arith.addf %136, %165 : vector<8x32xf32>
    %c0_73 = arith.constant 0 : index
    %c0_74 = arith.constant 0 : index
    %c0_75 = arith.constant 0 : index
    %167 = vector.load %arg16[%c0_73, %c0_74, %c0_75] : memref<1x1x32xf32, #tpu.memory_space<vmem>>, vector<1x1x32xf32>
    %168 = vector.shape_cast %167 : vector<1x1x32xf32> to vector<1x32xf32>
    %c0_76 = arith.constant 0 : index
    %c0_77 = arith.constant 0 : index
    %c0_78 = arith.constant 0 : index
    %169 = vector.load %arg17[%c0_76, %c0_77, %c0_78] : memref<1x1x32xf32, #tpu.memory_space<vmem>>, vector<1x1x32xf32>
    %170 = vector.shape_cast %169 : vector<1x1x32xf32> to vector<1x32xf32>
    %cst_79 = arith.constant dense<0.000000e+00> : vector<8xf32>
    %171 = vector.multi_reduction <add>, %166, %cst_79 [1] : vector<8x32xf32> to vector<8xf32>
    %172 = vector.shape_cast %171 : vector<8xf32> to vector<8x1xf32>
    %cst_80 = arith.constant 3.200000e+01 : f32
    %173 = vector.broadcast %cst_80 : f32 to vector<8x1xf32>
    %174 = arith.divf %172, %173 : vector<8x1xf32>
    %175 = vector.broadcast %174 : vector<8x1xf32> to vector<8x32xf32>
    %176 = arith.subf %166, %175 : vector<8x32xf32>
    %177 = arith.mulf %176, %176 : vector<8x32xf32>
    %cst_81 = arith.constant dense<0.000000e+00> : vector<8xf32>
    %178 = vector.multi_reduction <add>, %177, %cst_81 [1] : vector<8x32xf32> to vector<8xf32>
    %179 = vector.shape_cast %178 : vector<8xf32> to vector<8x1xf32>
    %cst_82 = arith.constant 3.200000e+01 : f32
    %180 = vector.broadcast %cst_82 : f32 to vector<8x1xf32>
    %181 = arith.divf %179, %180 : vector<8x1xf32>
    %182 = vector.broadcast %174 : vector<8x1xf32> to vector<8x32xf32>
    %183 = arith.subf %166, %182 : vector<8x32xf32>
    %cst_83 = arith.constant 9.99999974E-6 : f32
    %184 = vector.broadcast %cst_83 : f32 to vector<8x1xf32>
    %185 = arith.addf %181, %184 : vector<8x1xf32>
    %186 = math.rsqrt %185 : vector<8x1xf32>
    %187 = vector.broadcast %186 : vector<8x1xf32> to vector<8x32xf32>
    %188 = arith.mulf %183, %187 : vector<8x32xf32>
    %189 = vector.broadcast %168 : vector<1x32xf32> to vector<8x32xf32>
    %190 = arith.mulf %188, %189 : vector<8x32xf32>
    %191 = vector.broadcast %170 : vector<1x32xf32> to vector<8x32xf32>
    %192 = arith.addf %190, %191 : vector<8x32xf32>
    %c0_84 = arith.constant 0 : index
    %c0_85 = arith.constant 0 : index
    %193 = vector.load %arg21[%c0_84, %c0_85] : memref<8x32xf32, #tpu.memory_space<vmem>>, vector<8x32xf32>
    tpu.vector_store %arg21[%c0_84, %c0_85], %192 {strides = array<i32>} : memref<8x32xf32, #tpu.memory_space<vmem>>, vector<8x32xf32>,
    %c1_i32 = arith.constant 1 : i32
    %194 = arith.cmpi eq, %arg1, %c1_i32 : i32
    %195 = arith.extui %194 : i1 to i32
    %c0_i32_86 = arith.constant 0 : i32
    %196 = arith.cmpi ne, %195, %c0_i32_86 : i32
    scf.if %196 {
      %197 = arith.truncf %192 : vector<8x32xf32> to vector<8x32xbf16>
      %c0_87 = arith.constant 0 : index
      %c0_88 = arith.constant 0 : index
      %198 = vector.load %arg18[%c0_87, %c0_88] : memref<32x128xbf16, #tpu.memory_space<vmem>>, vector<32x128xbf16>
      %cst_89 = arith.constant dense<0.000000e+00> : vector<8x128xf32>
      %199 = tpu.matmul %197, %198, %cst_89 {dimension_numbers = #tpu.dot_dimension_numbers<[1], [0], [0], [1], [0, 0, 1, 1], [], []>} : vector<8x32xbf16>, vector<32x128xbf16>, vector<8x128xf32> -> vector<8x128xf32>
      %c0_90 = arith.constant 0 : index
      %c0_91 = arith.constant 0 : index
      %200 = vector.load %arg19[%c0_90, %c0_91] : memref<1x128xf32, #tpu.memory_space<vmem>>, vector<1x128xf32>
      %201 = vector.broadcast %200 : vector<1x128xf32> to vector<8x128xf32>
      %202 = arith.addf %199, %201 : vector<8x128xf32>
      %c0_92 = arith.constant 0 : index
      %c0_93 = arith.constant 0 : index
      %203 = vector.load %arg20[%c0_92, %c0_93] : memref<8x128xf32, #tpu.memory_space<vmem>>, vector<8x128xf32>
      tpu.vector_store %arg20[%c0_92, %c0_93], %202 {strides = array<i32>} : memref<8x128xf32, #tpu.memory_space<vmem>>, vector<8x128xf32>,
    } else {
    }
    return
  }
  func.func @transform_0(%arg0: i32, %arg1: i32) -> (i32, i32) {
    %c0_i32 = arith.constant 0 : i32
    %c0_i32_0 = arith.constant 0 : i32
    return %arg0, %c0_i32 : i32, i32
  }
  func.func @transform_1(%arg0: i32, %arg1: i32) -> (i32, i32, i32) {
    %c0_i32 = arith.constant 0 : i32
    %c0_i32_0 = arith.constant 0 : i32
    %c0_i32_1 = arith.constant 0 : i32
    return %arg0, %c0_i32, %c0_i32_0 : i32, i32, i32
  }
  func.func @transform_2(%arg0: i32, %arg1: i32) -> (i32, i32) {
    %c0_i32 = arith.constant 0 : i32
    %c0_i32_0 = arith.constant 0 : i32
    %c0_i32_1 = arith.constant 0 : i32
    return %c0_i32, %c0_i32_0 : i32, i32
  }
  func.func @transform_3(%arg0: i32, %arg1: i32) -> (i32, i32) {
    %c0_i32 = arith.constant 0 : i32
    %c0_i32_0 = arith.constant 0 : i32
    %c0_i32_1 = arith.constant 0 : i32
    return %c0_i32, %c0_i32_0 : i32, i32
  }
  func.func @transform_4(%arg0: i32, %arg1: i32) -> (i32, i32, i32) {
    %c0_i32 = arith.constant 0 : i32
    %c0_i32_0 = arith.constant 0 : i32
    %c0_i32_1 = arith.constant 0 : i32
    return %arg1, %c0_i32, %c0_i32_0 : i32, i32, i32
  }
  func.func @transform_5(%arg0: i32, %arg1: i32) -> (i32, i32, i32) {
    %c0_i32 = arith.constant 0 : i32
    %c0_i32_0 = arith.constant 0 : i32
    %c0_i32_1 = arith.constant 0 : i32
    return %arg1, %c0_i32, %c0_i32_0 : i32, i32, i32
  }
  func.func @transform_6(%arg0: i32, %arg1: i32) -> (i32, i32, i32) {
    %c0_i32 = arith.constant 0 : i32
    %c0_i32_0 = arith.constant 0 : i32
    %c0_i32_1 = arith.constant 0 : i32
    return %arg1, %c0_i32, %c0_i32_0 : i32, i32, i32
  }
  func.func @transform_7(%arg0: i32, %arg1: i32) -> (i32, i32, i32) {
    %c0_i32 = arith.constant 0 : i32
    %c0_i32_0 = arith.constant 0 : i32
    %c0_i32_1 = arith.constant 0 : i32
    return %arg1, %c0_i32, %c0_i32_0 : i32, i32, i32
  }
  func.func @transform_8(%arg0: i32, %arg1: i32) -> (i32, i32, i32) {
    %c0_i32 = arith.constant 0 : i32
    %c0_i32_0 = arith.constant 0 : i32
    %c0_i32_1 = arith.constant 0 : i32
    return %arg1, %c0_i32, %c0_i32_0 : i32, i32, i32
  }
  func.func @transform_9(%arg0: i32, %arg1: i32) -> (i32, i32, i32) {
    %c0_i32 = arith.constant 0 : i32
    %c0_i32_0 = arith.constant 0 : i32
    %c0_i32_1 = arith.constant 0 : i32
    return %arg1, %c0_i32, %c0_i32_0 : i32, i32, i32
  }
  func.func @transform_10(%arg0: i32, %arg1: i32) -> (i32, i32, i32) {
    %c0_i32 = arith.constant 0 : i32
    %c0_i32_0 = arith.constant 0 : i32
    %c0_i32_1 = arith.constant 0 : i32
    return %arg1, %c0_i32, %c0_i32_0 : i32, i32, i32
  }
  func.func @transform_11(%arg0: i32, %arg1: i32) -> (i32, i32, i32) {
    %c0_i32 = arith.constant 0 : i32
    %c0_i32_0 = arith.constant 0 : i32
    %c0_i32_1 = arith.constant 0 : i32
    return %arg1, %c0_i32, %c0_i32_0 : i32, i32, i32
  }
  func.func @transform_12(%arg0: i32, %arg1: i32) -> (i32, i32, i32) {
    %c0_i32 = arith.constant 0 : i32
    %c0_i32_0 = arith.constant 0 : i32
    %c0_i32_1 = arith.constant 0 : i32
    return %arg1, %c0_i32, %c0_i32_0 : i32, i32, i32
  }
  func.func @transform_13(%arg0: i32, %arg1: i32) -> (i32, i32, i32) {
    %c0_i32 = arith.constant 0 : i32
    %c0_i32_0 = arith.constant 0 : i32
    %c0_i32_1 = arith.constant 0 : i32
    return %arg1, %c0_i32, %c0_i32_0 : i32, i32, i32
  }
  func.func @transform_14(%arg0: i32, %arg1: i32) -> (i32, i32, i32) {
    %c0_i32 = arith.constant 0 : i32
    %c0_i32_0 = arith.constant 0 : i32
    %c0_i32_1 = arith.constant 0 : i32
    return %arg1, %c0_i32, %c0_i32_0 : i32, i32, i32
  }
  func.func @transform_15(%arg0: i32, %arg1: i32) -> (i32, i32, i32) {
    %c0_i32 = arith.constant 0 : i32
    %c0_i32_0 = arith.constant 0 : i32
    %c0_i32_1 = arith.constant 0 : i32
    return %arg1, %c0_i32, %c0_i32_0 : i32, i32, i32
  }
  func.func @transform_16(%arg0: i32, %arg1: i32) -> (i32, i32) {
    %c0_i32 = arith.constant 0 : i32
    %c0_i32_0 = arith.constant 0 : i32
    %c0_i32_1 = arith.constant 0 : i32
    return %c0_i32, %c0_i32_0 : i32, i32
  }
  func.func @transform_17(%arg0: i32, %arg1: i32) -> (i32, i32) {
    %c0_i32 = arith.constant 0 : i32
    %c0_i32_0 = arith.constant 0 : i32
    %c0_i32_1 = arith.constant 0 : i32
    return %c0_i32, %c0_i32_0 : i32, i32
  }
  func.func @transform_18(%arg0: i32, %arg1: i32) -> (i32, i32) {
    %c0_i32 = arith.constant 0 : i32
    %c0_i32_0 = arith.constant 0 : i32
    return %arg0, %c0_i32 : i32, i32
  }
}

</mosaic_0001>

<bundles_post_ra>
// kernel: _forward_impl.1
= control target key start
LH: loop header
LB: loop body
LE: loop exit
PB: predicated region body
PF: predicated region fallthrough
CT: control target
= control target key end

     0   :  { %s2697_s27 = smov 0   ;;  %s2699_s28 = smov 0   ;;  %s3009_s0 = inlined_call_operand.vmem [shape: f32[16,32], index: 0, kind: input, shape index: {}]   ;;  %s3010_s1 = inlined_call_operand.vmem [shape: f32[2,1,8], index: 1, kind: input, shape index: {}]   ;;  %s3011_s2 = inlined_call_operand.vmem [shape: f32[1,32], index: 2, kind: input, shape index: {}]   ;;  %s3012_s3 = inlined_call_operand.vmem [shape: f32[1,32], index: 3, kind: input, shape index: {}]   ;;  %s3013_s4 = inlined_call_operand.vmem [shape: bf16[2,32,96], index: 4, kind: input, shape index: {}]   ;;  %s3014_s5 = inlined_call_operand.vmem [shape: f32[2,1,96], index: 5, kind: input, shape index: {}]   ;;  %s3015_s6 = inlined_call_operand.vmem [shape: bf16[2,32,32], index: 6, kind: input, shape index: {}]   ;;  %s3016_s7 = inlined_call_operand.vmem [shape: f32[2,1,32], index: 7, kind: input, shape index: {}]   ;;  %s3017_s8 = inlined_call_operand.vmem [shape: f32[2,1,32], index: 8, kind: input, shape index: {}]   ;;  %s3018_s9 = inlined_call_operand.vmem [shape: f32[2,1,32], index: 9, kind: input, shape index: {}]   ;;  %s3019_s10 = inlined_call_operand.vmem [shape: bf16[2,32,64], index: 10, kind: input, shape index: {}]   ;;  %s3020_s11 = inlined_call_operand.vmem [shape: f32[2,1,64], index: 11, kind: input, shape index: {}]   ;;  %s3021_s12 = inlined_call_operand.vmem [shape: bf16[2,64,32], index: 12, kind: input, shape index: {}]   ;;  %s3022_s13 = inlined_call_operand.vmem [shape: f32[2,1,32], index: 13, kind: input, shape index: {}]   ;;  %s3023_s14 = inlined_call_operand.vmem [shape: f32[2,1,32], index: 14, kind: input, shape index: {}]   ;;  %s3024_s15 = inlined_call_operand.vmem [shape: f32[2,1,32], index: 15, kind: input, shape index: {}]   ;;  %s3025_s16 = inlined_call_operand.vmem [shape: bf16[32,128], index: 16, kind: input, shape index: {}]   ;;  %s3026_s17 = inlined_call_operand.vmem [shape: f32[1,128], index: 17, kind: input, shape index: {}]   ;;  %s3027_s18 = inlined_call_operand.vmem [shape: f32[16,128], index: 18, kind: output, shape index: {}]  }
   0x1   :  { %3034 = sst [smem:[#allocation10_spill]] %s3009_s0  ;;  %s2701_s29 = smov 0  }
   0x2   :  { %3035 = sst [smem:[#allocation11_spill]] %s3010_s1  ;;  %s2703_s30 = smov 0  }
   0x3   :  { %3036 = sst [smem:[#allocation12_spill]] %s3011_s2  ;;  %s2705_s0 = smov 0  }
   0x4   :  { %3037 = sst [smem:[#allocation13_spill]] %s3012_s3 }
   0x5   :  { %3038 = sst [smem:[#allocation14_spill]] %s3013_s4 }
   0x6   :  { %3039 = sst [smem:[#allocation15_spill]] %s3015_s6 }
   0x7   :  { %3040 = sst [smem:[#allocation16_spill]] %s3019_s10 }
   0x8   :  { %3041 = sst [smem:[#allocation17_spill]] %s3020_s11 }
   0x9   :  { %3042 = sst [smem:[#allocation18_spill]] %s3024_s15 }
   0xa   :  { %3043 = sst [smem:[#allocation19_spill]] %s3025_s16 }
   0xb   :  { %3044 = sst [smem:[#allocation20_spill]] %s3026_s17 }
   0xc   :  { %3045 = sst [smem:[#allocation21_spill]] %s3027_s18 }
   0xd LB: > { %3046 = sst [smem:[#allocation3_spill]] %s2569_s27  ;;  %s37_s19 = sadd.s32 1, %s2577_s29  ;;  %s2585_s0 = sphi %s2705_s0, %s28_s0   ;;  %s2581_s30 = sphi %s2703_s30, %s3081_s30   ;;  %s2577_s29 = sphi %s2701_s29, %s3080_s29   ;;  %s2573_s28 = sphi %s2699_s28, %s3079_s28   ;;  %s2569_s27 = sphi %s2697_s27, %s3078_s27  }
   0xe   : > { %3047 = sst [smem:[#allocation4_spill]] %s2577_s29  ;;  %s40_s1 = sadd.s32 1, %s2581_s30 }
   0xf   : > { %3048 = sst [smem:[#allocation5_spill]] %s2581_s30  ;;  %p38_p0 = scmp.ge.s32.totalorder %s37_s19, 2 }
  0x10   : > { %3049 = sst [smem:[#allocation6_spill]] %s2585_s0  ;;  %p2259_p1 = scmp.ge.s32.totalorder %s2585_s0, 1 }
  0x11   : > { %p635_p2 = scmp.lt.s32.totalorder %s2585_s0, 5  ;;  %s3083_s19 = smov (%p38_p0, %s37_s19), 0 }
  0x12   : > { %3050 = sst [smem:[#allocation7_spill]] %s3083_s19  ;;  %s3085_s1 = smov (!%p38_p0, %s40_s1), %s2581_s30 }
  0x13   : > { %p636_p3 = pnand %p2259_p1, %p635_p2  ;;  %p42_p4 = scmp.ge.s32.totalorder %s3085_s1, 2 }
  0x15   : > { %s3087_s1 = smov (%p42_p4, %s3085_s1), 0  ;;  %639 = sbr.rel (%p636_p3) target bundleno = 4777 (0x12a9), region = 92 }
  0x16   : > { %3051 = sst [smem:[#allocation8_spill]] %s3087_s1 }
  0x1c   : > { %p734_p5 = scmp.lt.s32.totalorder %s2573_s28, 1  ;;  %p741_p6 = scmp.lt.s32.totalorder %s2569_s27, 1 }
  0x1d   : > { %s3054_s1 = sld [smem:[#allocation10_spill]]  ;;  %s3055_s4 = sld [smem:[#allocation14_spill]] }
  0x1e   : > { %s3089_s28 = smov (!%p734_p5, %s2573_s28), 1  ;;  %s3056_s6 = sld [smem:[#allocation15_spill]] }
  0x1f   : > { %3052 = sst [smem:[#allocation9_spill]] %s3089_s28  ;;  %s2260_s21 = sshll.u32 %s3089_s28, 3 }
  0x20   : > { %s2733_s20 = scalar_select %p741_p6, %s2569_s27, 1 }
  0x21   : > { %s3057_s10 = sld [smem:[#allocation16_spill]]  ;;  %s3060_s27 = sld [smem:[#allocation21_spill]] }
  0x22   : > { %s2316_s30 = sshll.u32 %s2733_s20, 4  ;;  %s778_s25 = scalar_lea.vmem %s3022_s13, %s2733_s20 }
  0x23   : > { %s737_s19 = scalar_lea.vmem %s3054_s1, %s2260_s21  ;;  %s2747_s17 = scalar_lea.vmem %s3055_s4, %s2316_s30 }
  0x24   : > { %s2756_s22 = scalar_lea.vmem %s3056_s6, %s2316_s30  ;;  %s2319_s6 = sshll.u32 %s2733_s20, 5 }
  0x25   : > { %s2787_s24 = scalar_lea.vmem %s3021_s12, %s2319_s6  ;;  %s781_s28 = scalar_lea.vmem %s3023_s14, %s2733_s20 }
  0x26   : > { %s3059_s4 = sld [smem:[#allocation18_spill]]  ;;  %s3061_s2 = sld [smem:[#allocation3_spill]] }
  0x27   : > { %s2773_s16 = scalar_lea.vmem %s3057_s10, %s2316_s30  ;;  %s2800_s11 = scalar_lea.vmem %s3060_s27, %s2260_s21 }
  0x2c   : > { %s784_s10 = scalar_lea.vmem %s3059_s4, %s2733_s20  ;;  %p2270_p7 = scmp.ne.s32.totalorder %s3061_s2, 0 }
  0x2d   : > { %v794_v0 = vld [vmem:[%s737_s19] sm:$0xff] (!%p2270_p7)  ;;  %vm797_vm0 = vcmask (!%p2270_p7), 261120   ;;  %s3062_s27 = sld [smem:[#allocation12_spill]] (!%p2270_p7)  ;;  %s3063_s23 = sld [smem:[#allocation13_spill]] (!%p2270_p7) }
  0x2e   : > { %793 = sbr.rel (%p2270_p7) target bundleno = 360 (0x168), region = 96  ;;  %v798_v1 = vsel (!%p2270_p7), %vm797_vm0, %v794_v0, 0.0 }
  0x2f   : > { %799 = vadd.xlane.f32.xlu0 (!%p2270_p7), %v798_v1 }
  0x33   : > { %v2271_v11 = vld [vmem:[%s3062_s27] ss:$0 sm:$0xff] (!%p2270_p7) }
  0x34   : > { %v2272_v13 = vld [vmem:[%s3063_s23] ss:$0 sm:$0xff] (!%p2270_p7) }
  0xbc   : > { %v800_v2 = vpop.xlane.xlu0 %799 }
  0xbd   : > { %v802_v3 = vmul.f32 0.03125, %v800_v2 }
  0xbf   : > { %v803_v4 = vsub.f32 %v794_v0, %v802_v3 }
  0xc1   : > { %v804_v5 = vmul.f32 %v803_v4, %v803_v4 }
  0xc3   : > { %v805_v6 = vsel %vm797_vm0, %v804_v5, 0.0 }
  0xc4   : > { %806 = vadd.xlane.f32.xlu0 %v805_v6 }
 0x151   : > { %v807_v7 = vpop.xlane.xlu0 %806 }
 0x152   : > { %v808_v8 = vmul.f32 0.03125, %v807_v7 }
 0x154   : > { %v809_v9 = vadd.f32 1e-05, %v808_v8 }
 0x156   : > { %2513 = vrsqrt.f32 %v809_v9 }
 0x160   : > { %v2514_v10 = vpop.eup %2513 }
 0x161   : > { %v811_v12 = vmul.f32 %v2514_v10, %v803_v4 }
 0x163   : > { %v818_v14 = vmul.f32 %v2271_v11, %v811_v12 }
 0x165   : > { %v825_v15 = vadd.f32 %v2272_v13, %v818_v14 }
 0x167   : > { %826 = vst.msk [vmem:[#allocation2] sm:$0xff] %vm797_vm0, %v825_v15 }
 0x168 PF: > { %v2515_v16 = vld [vmem:[%s2747_s17] sm:$0xff]   ;;  %v2587_v17 = vmov 0.0   ;;  %v2516_v18 = vld [vmem:[%s2747_s17 + $0x8] sm:$0xff]   ;;  %vm2588_vm1 = vmmov 0   ;;  %vm853_vm2 = vcmask 261120   ;;  %s3064_s26 = scalar_lea.vmem %s3014_s5, %s2733_s20  ;;  %s2589_s29 = smov 64  }
 0x169   : > { %2358 = vmatprep.subr.bf16.mxu0 %v2587_v17  ;;  %2371 = vmatprep.subr.mxu1 %v2587_v17  ;;  %v2273_v21 = vld [vmem:[%s3064_s26] ss:$0 sm:$0xff]  ;;  %s3065_s0 = sld [smem:[#allocation9_spill]]  ;;  %s2590_s30 = smov 96   ;;  %vm907_vm3 = vcmask 64512   ;;  %vm1242_vm4 = vcmask 1043456  }
 0x16a   : > { %2359 = vmatpush3.bf16.msra.mxu0 %v2515_v16  ;;  %2362 = vmatprep.mubr.msk.bf16.mxu0 %vm2588_vm1, %v2587_v17  ;;  %s2591_s3 = smov 88   ;;  %s3066_s2 = sld [smem:[#allocation11_spill]]  ;;  %v1238_v56 = vld [vmem:[%s2756_s22 + $0x4] sm:$0xf]  ;;  %v1071_v60 = vld [vmem:[%s2756_s22] sm:$0xf] }
 0x16b   : > { %2360 = vmatprep.subr.bf16.mxu0 %v2587_v17  ;;  %2373 = vmatprep.mubr.msk.f32.mxu1 %vm2588_vm1, %v2587_v17  ;;  %s2592_s6 = smov 120   ;;  %s2593_s27 = smov 56   ;;  %v1244_v57 = vsel %vm1242_vm4, %v1238_v56, 0  ;;  %v1290_v63 = vsel %vm1242_vm4, %v1071_v60, 0  ;;  %vm1915_vm5 = vcmask 523264  }
 0x16c   : > { %s2594_s19 = smov 80   ;;  %s2595_s21 = smov 112  }
 0x16d   : > { %s2596_s23 = smov 48   ;;  %s2597_s17 = smov 72  }
 0x16e   : > { %v2818_v19 = vld [vmem:[#allocation2] sm:$0xff]  ;;  %2361 = vmatpush3.bf16.msra.mxu0 %v2516_v18  ;;  %s2598_s1 = smov 104   ;;  %s2599_s26 = smov 40  }
 0x16f   : > { %v829_v20 = vpack.c.bf16 %v2818_v19, %v2818_v19  ;;  %2366 = vmatprep.subr.mxu0 %v2587_v17  ;;  %s3069_s15 = scalar_lea.vmem %s3017_s8, %s2733_s20 }
 0x170   : > { %s3067_s4 = scalar_lea.vmem %s3066_s2, %s3065_s0 }
 0x171   : > { %2363 = vmatmul.mubr.msk.bf16.vlgmr.msra.gmra.mrb[0].mxu0 %vm853_vm2, %v829_v20  ;;  %v2854_v30 = vld [vmem:[%s3067_s4] ss:$0 sm:$0xff] }
 0x172   : > { %2368 = vmatprep.mubr.msk.f32.mxu0 %vm2588_vm1, %v2587_v17 }
 0x244   : > { %v891_v22 = vpop.f32.mrb[0].mxu0 }
 0x245   : > { %v2834_v23 = vadd.f32 %v2273_v21, %v891_v22  ;;  %v2364_v24 = vpop.f32.mrb[1].mxu0 }
 0x246   : > { %v894_v25 = vpop.f32.mrb[2].mxu0 }
 0x247   : > { %994 = vrot.lane.b32.xlu1 %v2834_v23, %s2589_s29  ;;  %905 = vrot.lane.b32.xlu0 %v2834_v23, %s2590_s30  ;;  %v2365_v26 = vpop.f32.mrb[3].mxu0  ;;  %v2841_v29 = vmul.f32 0.35355338, %v2834_v23  ;;  %s3068_s30 = scalar_lea.vmem %s3016_s7, %s2733_s20  ;;  %s3074_s29 = sld [smem:[#allocation3_spill]] }
 0x24b   : > { %1074 = vrot.lane.b32.xlu1 %v2834_v23, %s2591_s3 }
 0x24d   : > { %p2309_p8 = scmp.ne.s32.totalorder %s3074_s29, 1 }
 0x24e   : > { %vm2601_vm6 = vmmov (!%p2309_p8), 0  }
 0x2b9   : > { %v995_v27 = vpop.permute.xlu1 %994  ;;  %v906_v28 = vpop.permute.xlu0 %905 }
 0x2ba   : > { %2367 = vmatpush3.xpose.msk.msra.mxu0 %vm907_vm3, %v906_v28  ;;  %2372 = vmatpush3.msra.mxu1 %v995_v27 }
 0x2bb   : > { %2376 = vmatprep.subr.mxu1 %v2587_v17  ;;  %2381 = vmatprep.subr.mxu0 %v2587_v17 }
 0x2bd   : > { %2369 = vmatmul.mubr.msk.f32.vlgmr.msra.gmra.mrb[4].mxu0 %vm907_vm3, %v2841_v29  ;;  %v1075_v40 = vpop.permute.xlu1 %1074 }
 0x2be   : > { %2383 = vmatprep.mubr.msk.f32.mxu0 %vm2588_vm1, %v2587_v17 }
 0x390   : > { %v979_v31 = vpop.f32.mrb[4].mxu0 }
 0x391   : > { %v980_v32 = vadd.f32 %v2854_v30, %v979_v31  ;;  %v2370_v33 = vpop.f32.mrb[5].mxu0 }
 0x393   : > { %v983_v34 = vsel %vm907_vm3, %v980_v32, -inf }
 0x394   : > { %984 = vmax.xlane.f32.xlu0 %v983_v34  ;;  %v1498_v34 = vld [vmem:[%s2756_s22 + $0x8] sm:$0xf] }
 0x421   : > { %v985_v35 = vpop.xlane.xlu0 %984 }
 0x422   : > { %v986_v36 = vsub.f32 %v980_v32, %v985_v35  ;;  %v1503_v35 = vsel %vm1242_vm4, %v1498_v34, 0 }
 0x424   : > { %v987_v37 = vmul.f32 1.442695, %v986_v36 }
 0x426   : > { %2523 = vpow2.f32 %v987_v37 }
 0x430   : > { %v2524_v38 = vpop.eup %2523 }
 0x431   : > { %v989_v39 = vsel %vm907_vm3, %v2524_v38, 0.0 }
 0x432   : > { %990 = vadd.xlane.f32.xlu1 %v989_v39 }
 0x443   : > { %1072 = vrot.lane.b32.xlu1 %v2841_v29, %s2592_s6 }
 0x4bf   : > { %v991_v41 = vpop.xlane.xlu1 %990 }
 0x4c0   : > { %2525 = vrcp.f32 %v991_v41 }
 0x4c3   : > { %v1073_v44 = vpop.permute.xlu1 %1072 }
 0x4ca   : > { %v2526_v42 = vpop.eup %2525 }
 0x4cb   : > { %v993_v43 = vmul.f32 %v2526_v42, %v2524_v38 }
 0x4cd   : > { %2374 = vmatmul.mubr.msk.f32.vlgmr.msra.gmra.mrb[0].mxu1 %vm907_vm3, %v993_v43 }
 0x4ce   : > { %2377 = vmatpush3.xpose.msk.msra.mxu1 %vm907_vm3, %v1075_v40  ;;  %2378 = vmatprep.mubr.msk.f32.mxu1 %vm2588_vm1, %v2587_v17 }
 0x4cf   : > { %2386 = vmatprep.subr.bf16.mxu1 %v2587_v17 }
 0x4d1   : > { %2379 = vmatmul.mubr.msk.f32.vlgmr.msra.gmra.mrb[2].mxu1 %vm907_vm3, %v1073_v44 }
 0x4d2   : > { %2388 = vmatprep.mubr.msk.bf16.mxu1 %vm2588_vm1, %v2587_v17  ;;  %2387 = vmatpush3.bf16.msra.mxu1 %v1244_v57 }
 0x4d3   : > { %2398 = vmatprep.subr.mxu1 %v2587_v17 }
 0x5a0   : > { %v1066_v45 = vpop.f32.mrb[0].mxu1 }
 0x5a1   : > { %v2375_v46 = vpop.f32.mrb[1].mxu1  ;;  %v1070_v0 = vpack.c.bf16 %v1066_v45, %v1066_v45 }
 0x5a4   : > { %v1146_v47 = vpop.f32.mrb[2].mxu1 }
 0x5a5   : > { %v1147_v48 = vadd.f32 %v2854_v30, %v1146_v47  ;;  %v2380_v49 = vpop.f32.mrb[3].mxu1 }
 0x5a7   : > { %v1150_v50 = vsel %vm907_vm3, %v1147_v48, -inf }
 0x5a8   : > { %1151 = vmax.xlane.f32.xlu1 %v1150_v50 }
 0x635   : > { %v1152_v51 = vpop.xlane.xlu1 %1151 }
 0x636   : > { %v1153_v52 = vsub.f32 %v1147_v48, %v1152_v51 }
 0x638   : > { %v1154_v53 = vmul.f32 1.442695, %v1153_v52 }
 0x63a   : > { %2527 = vpow2.f32 %v1154_v53 }
 0x644   : > { %v2528_v54 = vpop.eup %2527 }
 0x645   : > { %v1156_v55 = vsel %vm907_vm3, %v2528_v54, 0.0 }
 0x646   : > { %1157 = vadd.xlane.f32.xlu0 %v1156_v55 }
 0x65c   : > { %1161 = vrot.lane.b32.xlu0 %v2834_v23, %s2593_s27  ;;  %s3071_s27 = sld [smem:[#allocation17_spill]] }
 0x660   : > { %1334 = vrot.lane.b32.xlu0 %v2834_v23, %s2594_s19 }
 0x662   : > { %s3072_s19 = scalar_lea.vmem %s3071_s27, %s2733_s20 }
 0x664   : > { %1332 = vrot.lane.b32.xlu0 %v2841_v29, %s2595_s21 }
 0x6d3   : > { %v1158_v58 = vpop.xlane.xlu0 %1157 }
 0x6d4   : > { %2529 = vrcp.f32 %v1158_v58 }
 0x6d7   : > { %v1162_v59 = vpop.permute.xlu0 %1161 }
 0x6d8   : > { %2382 = vmatpush3.msra.mxu0 %v1162_v59 }
 0x6d9   : > { %2392 = vmatprep.subr.bf16.mxu0 %v2587_v17 }
 0x6db   : > { %v1335_v4 = vpop.permute.xlu0 %1334 }
 0x6de   : > { %v2530_v61 = vpop.eup %2529 }
 0x6df   : > { %v1160_v62 = vmul.f32 %v2530_v61, %v2528_v54  ;;  %v1333_v9 = vpop.permute.xlu0 %1332  ;;  %v2294_v61 = vld [vmem:[%s3068_s30] ss:$0 sm:$0xff] }
 0x6e1   : > { %2384 = vmatmul.mubr.msk.f32.vlgmr.msra.gmra.mrb[6].mxu0 %vm907_vm3, %v1160_v62 }
 0x6e2   : > { %2393 = vmatpush3.bf16.msra.mxu0 %v1290_v63  ;;  %2394 = vmatprep.mubr.msk.bf16.mxu0 %vm2588_vm1, %v2587_v17 }
 0x6e3   : > { %2403 = vmatprep.subr.mxu0 %v2587_v17 }
 0x6e5   : > { %2395 = vmatmul.mubr.msk.bf16.vlgmr.msra.gmra.mrb[8].mxu0 %vm907_vm3, %v1070_v0 }
 0x6e6   : > { %2405 = vmatprep.mubr.msk.f32.mxu0 %vm2588_vm1, %v2587_v17 }
 0x7b4   : > { %v1233_v1 = vpop.f32.mrb[6].mxu0 }
 0x7b5   : > { %v1237_v2 = vpack.c.bf16 %v1233_v1, %v1233_v1  ;;  %v2385_v3 = vpop.f32.mrb[7].mxu0 }
 0x7b7   : > { %2389 = vmatmul.mubr.msk.bf16.vlgmr.msra.gmra.mrb[4].mxu1 %vm907_vm3, %v1237_v2 }
 0x7b8   : > { %2399 = vmatpush3.xpose.msk.msra.mxu1 %vm907_vm3, %v1335_v4  ;;  %v1326_v5 = vpop.f32.mrb[8].mxu0  ;;  %2400 = vmatprep.mubr.msk.f32.mxu1 %vm2588_vm1, %v2587_v17 }
 0x7b9   : > { %v2396_v6 = vpop.f32.mrb[9].mxu0  ;;  %2408 = vmatprep.subr.bf16.mxu1 %v2587_v17 }
 0x7ba   : > { %v1329_v7 = vpop.f32.mrb[10].mxu0 }
 0x7bb   : > { %v2397_v8 = vpop.f32.mrb[11].mxu0 }
 0x7bf   : > { %2401 = vmatmul.mubr.msk.f32.vlgmr.msra.gmra.mrb[8].mxu1 %vm907_vm3, %v1333_v9 }
 0x7c0   : > { %2410 = vmatprep.mubr.msk.bf16.mxu1 %vm2588_vm1, %v2587_v17  ;;  %2409 = vmatpush3.bf16.msra.mxu1 %v1503_v35 }
 0x7c1   : > { %2424 = vmatprep.subr.bf16.mxu1 %v2587_v17 }
 0x88a   : > { %v1280_v10 = vpop.f32.mrb[4].mxu1 }
 0x88b   : > { %v1327_v11 = vadd.f32 %v1326_v5, %v1280_v10  ;;  %v2390_v12 = vpop.f32.mrb[5].mxu1  ;;  %v2517_v10 = vld [vmem:[%s2773_s16] sm:$0xff]  }
 0x88c   : > { %v1283_v13 = vpop.f32.mrb[6].mxu1 }
 0x88d   : > { %v2391_v14 = vpop.f32.mrb[7].mxu1 }
 0x892   : > { %v1406_v15 = vpop.f32.mrb[8].mxu1 }
 0x893   : > { %v1407_v16 = vadd.f32 %v2854_v30, %v1406_v15  ;;  %v2402_v18 = vpop.f32.mrb[9].mxu1  ;;  %v2295_v15 = vld [vmem:[%s3069_s15] ss:$0 sm:$0xff]  ;;  %s3076_s15 = sld [smem:[#allocation20_spill]] (!%p2309_p8) }
 0x895   : > { %v1410_v20 = vsel %vm907_vm3, %v1407_v16, -inf }
 0x896   : > { %1411 = vmax.xlane.f32.xlu1 %v1410_v20 }
 0x8a7   : > { %1421 = vrot.lane.b32.xlu1 %v2834_v23, %s2596_s23 }
 0x8ab   : > { %1548 = vrot.lane.b32.xlu1 %v2834_v23, %s2597_s17 }
 0x8af   : > { %1546 = vrot.lane.b32.xlu1 %v2841_v29, %s2598_s1 }
 0x923   : > { %v1412_v21 = vpop.xlane.xlu1 %1411 }
 0x924   : > { %v1413_v22 = vsub.f32 %v1407_v16, %v1412_v21 }
 0x926   : > { %v1414_v24 = vmul.f32 1.442695, %v1413_v22 }
 0x927   : > { %v1422_v25 = vpop.permute.xlu1 %1421 }
 0x928   : > { %2531 = vpow2.f32 %v1414_v24  ;;  %2404 = vmatpush3.msra.mxu0 %v1422_v25  ;;  %v2519_v24 = vld [vmem:[%s2787_s24] sm:$0xff]   ;;  %v2520_v25 = vld [vmem:[%s2787_s24 + $0x8] sm:$0xff]  }
 0x929   : > { %2414 = vmatprep.subr.mxu0 %v2587_v17 }
 0x92b   : > { %v1549_v32 = vpop.permute.xlu1 %1548 }
 0x92f   : > { %v1547_v29 = vpop.permute.xlu1 %1546 }
 0x932   : > { %v2532_v26 = vpop.eup %2531 }
 0x933   : > { %v1416_v27 = vsel %vm907_vm3, %v2532_v26, 0.0 }
 0x934   : > { %1417 = vadd.xlane.f32.xlu0 %v1416_v27  ;;  %v2522_v27 = vld [vmem:[%s2787_s24 + $0x18] sm:$0xff]  }
 0x9c1   : > { %v1418_v28 = vpop.xlane.xlu0 %1417 }
 0x9c2   : > { %2533 = vrcp.f32 %v1418_v28  ;;  %v2297_v28 = vld [vmem:[%s3072_s19] ss:$0 sm:$0xff] }
 0x9cc   : > { %v2534_v31 = vpop.eup %2533 }
 0x9cd   : > { %v1420_v33 = vmul.f32 %v2534_v31, %v2532_v26  ;;  %v2521_v26 = vld [vmem:[%s2787_s24 + $0x10] sm:$0xff]  }
 0x9cf   : > { %2406 = vmatmul.mubr.msk.f32.vlgmr.msra.gmra.mrb[12].mxu0 %vm907_vm3, %v1420_v33 }
 0x9d0   : > { %2415 = vmatpush3.xpose.msk.msra.mxu0 %vm907_vm3, %v1549_v32  ;;  %2416 = vmatprep.mubr.msk.f32.mxu0 %vm2588_vm1, %v2587_v17 }
 0x9d1   : > { %2419 = vmatprep.subr.mxu0 %v2587_v17 }
 0x9d3   : > { %2417 = vmatmul.mubr.msk.f32.vlgmr.msra.gmra.mrb[14].mxu0 %vm907_vm3, %v1547_v29 }
 0x9d4   : > { %2421 = vmatprep.mubr.msk.f32.mxu0 %vm2588_vm1, %v2587_v17 }
 0xaa2   : > { %v1493_v36 = vpop.f32.mrb[12].mxu0 }
 0xaa3   : > { %v1497_v37 = vpack.c.bf16 %v1493_v36, %v1493_v36  ;;  %v2407_v38 = vpop.f32.mrb[13].mxu0 }
 0xaa5   : > { %2411 = vmatmul.mubr.msk.bf16.vlgmr.msra.gmra.mrb[12].mxu1 %vm907_vm3, %v1497_v37 }
 0xaa6   : > { %v1620_v39 = vpop.f32.mrb[14].mxu0  ;;  %2426 = vmatprep.mubr.msk.bf16.mxu1 %vm2588_vm1, %v2587_v17 }
 0xaa7   : > { %v1621_v40 = vadd.f32 %v2854_v30, %v1620_v39  ;;  %v2418_v41 = vpop.f32.mrb[15].mxu0 }
 0xaa9   : > { %v1624_v42 = vsel %vm907_vm3, %v1621_v40, -inf }
 0xaaa   : > { %1625 = vmax.xlane.f32.xlu1 %v1624_v42 }
 0xb37   : > { %v1626_v43 = vpop.xlane.xlu1 %1625 }
 0xb38   : > { %v1627_v44 = vsub.f32 %v1621_v40, %v1626_v43 }
 0xb3a   : > { %v1628_v45 = vmul.f32 1.442695, %v1627_v44  ;;  %v2301_v44 = vld [vmem:[%s778_s25] ss:$0 sm:$0xff] }
 0xb3c   : > { %2535 = vpow2.f32 %v1628_v45 }
 0xb46   : > { %v2536_v46 = vpop.eup %2535 }
 0xb47   : > { %v1630_v47 = vsel %vm907_vm3, %v2536_v46, 0.0 }
 0xb48   : > { %1631 = vadd.xlane.f32.xlu0 %v1630_v47 }
 0xb5e   : > { %1635 = vrot.lane.b32.xlu0 %v2834_v23, %s2599_s26  ;;  %v1712_v23 = vld [vmem:[%s2756_s22 + $0xc] sm:$0xf]  ;;  %s3075_s22 = sld [smem:[#allocation19_spill]] (!%p2309_p8) }
 0xb5f   : > { %v1717_v56 = vsel %vm1242_vm4, %v1712_v23, 0 }
 0xb60   : > { %2425 = vmatpush3.bf16.msra.mxu1 %v1717_v56 }
 0xb61   : > { %2438 = vmatprep.subr.bf16.mxu1 %v2587_v17 }
 0xb78   : > { %v1539_v48 = vpop.f32.mrb[12].mxu1 }
 0xb79   : > { %v1545_v49 = vadd.f32 %v1539_v48, %v1327_v11  ;;  %v2412_v50 = vpop.f32.mrb[13].mxu1  ;;  %v2518_v11 = vld [vmem:[%s2773_s16 + $0x8] sm:$0xff]   ;;  %s3070_s16 = scalar_lea.vmem %s3018_s9, %s2733_s20 }
 0xb7a   : > { %v1542_v30 = vpop.f32.mrb[14].mxu1  ;;  %v2296_v18 = vld [vmem:[%s3070_s16] ss:$0 sm:$0xff] }
 0xb7b   : > { %v2413_v51 = vpop.f32.mrb[15].mxu1 }
 0xbd5   : > { %v1632_v52 = vpop.xlane.xlu0 %1631 }
 0xbd6   : > { %2537 = vrcp.f32 %v1632_v52 }
 0xbd9   : > { %v1636_v53 = vpop.permute.xlu0 %1635 }
 0xbda   : > { %2420 = vmatpush3.msra.mxu0 %v1636_v53 }
 0xbdb   : > { %2430 = vmatprep.subr.bf16.mxu0 %v2587_v17 }
 0xbe0   : > { %v2538_v54 = vpop.eup %2537 }
 0xbe1   : > { %v1634_v55 = vmul.f32 %v2538_v54, %v2536_v46 }
 0xbe3   : > { %2422 = vmatmul.mubr.msk.f32.vlgmr.msra.gmra.mrb[16].mxu0 %vm907_vm3, %v1634_v55 }
 0xbe4   : > { %2434 = vmatprep.mubr.msk.bf16.mxu0 %vm2588_vm1, %v2587_v17  ;;  %2431 = vmatpush3.bf16.msra.mxu0 %v2517_v10 }
 0xbe5   : > { %2432 = vmatprep.subr.bf16.mxu0 %v2587_v17 }
 0xbe8   : > { %2433 = vmatpush3.bf16.msra.mxu0 %v2518_v11 }
 0xcb6   : > { %v1707_v57 = vpop.f32.mrb[16].mxu0 }
 0xcb7   : > { %v1711_v58 = vpack.c.bf16 %v1707_v57, %v1707_v57  ;;  %v2423_v59 = vpop.f32.mrb[17].mxu0 }
 0xcb8   : > { %v2307_v59 = vld [vmem:[%s781_s28] ss:$0 sm:$0xff] }
 0xcb9   : > { %2427 = vmatmul.mubr.msk.bf16.vlgmr.msra.gmra.mrb[16].mxu1 %vm907_vm3, %v1711_v58 }
 0xcba   : > { %2446 = vmatprep.mubr.msk.bf16.mxu1 %vm2588_vm1, %v2587_v17  ;;  %2439 = vmatpush3.bf16.msra.mxu1 %v2519_v24 }
 0xcbb   : > { %2440 = vmatprep.subr.bf16.mxu1 %v2587_v17 }
 0xcbe   : > { %2441 = vmatpush3.bf16.msra.mxu1 %v2520_v25 }
 0xcbf   : > { %2442 = vmatprep.subr.bf16.mxu1 %v2587_v17 }
 0xcc2   : > { %2443 = vmatpush3.bf16.msra.mxu1 %v2521_v26 }
 0xcc3   : > { %2444 = vmatprep.subr.bf16.mxu1 %v2587_v17 }
 0xcc6   : > { %2445 = vmatpush3.bf16.msra.mxu1 %v2522_v27 }
 0xd8c   : > { %v1753_v60 = vpop.f32.mrb[16].mxu1 }
 0xd8d   : > { %v1759_v62 = vadd.f32 %v1753_v60, %v1545_v49  ;;  %v2428_v63 = vpop.f32.mrb[17].mxu1 }
 0xd8e   : > { %v1756_v0 = vpop.f32.mrb[18].mxu1 }
 0xd8f   : > { %v1767_v1 = vadd.f32 %v2294_v61, %v1759_v62  ;;  %v2429_v2 = vpop.f32.mrb[19].mxu1  ;;  %v2308_v61 = vld [vmem:[%s784_s10] ss:$0 sm:$0xff] }
 0xd90   : > { %v2545_v0 = vld [vmem:[%s3075_s22] sm:$0xff] (!%p2309_p8)   ;;  %v2546_v2 = vld [vmem:[%s3075_s22 + $0x8] sm:$0xff] (!%p2309_p8)  }
 0xd91   : > { %v1768_v3 = vadd.f32 %v1767_v1, %v2818_v19  ;;  %v2600_v1 = vmov (!%p2309_p8), 0.0  }
 0xd92   : > { %2450 = vmatprep.subr.bf16.mxu0 (!%p2309_p8), %v2600_v1 }
 0xd93   : > { %v1771_v4 = vsel %vm853_vm2, %v1768_v3, 0.0 }
 0xd94   : > { %1772 = vadd.xlane.f32.xlu0 %v1771_v4  ;;  %v2310_v4 = vld [vmem:[%s3076_s15] ss:$0 sm:$0xff] (!%p2309_p8) }
 0xe21   : > { %v1773_v5 = vpop.xlane.xlu0 %1772 }
 0xe22   : > { %v1775_v6 = vmul.f32 0.03125, %v1773_v5 }
 0xe24   : > { %v1776_v7 = vsub.f32 %v1768_v3, %v1775_v6 }
 0xe26   : > { %v1777_v8 = vmul.f32 %v1776_v7, %v1776_v7 }
 0xe28   : > { %v1778_v9 = vsel %vm853_vm2, %v1777_v8, 0.0 }
 0xe29   : > { %1779 = vadd.xlane.f32.xlu1 %v1778_v9 }
 0xeb6   : > { %v1780_v19 = vpop.xlane.xlu1 %1779 }
 0xeb7   : > { %v1781_v12 = vmul.f32 0.03125, %v1780_v19 }
 0xeb9   : > { %v1782_v13 = vadd.f32 1e-05, %v1781_v12 }
 0xebb   : > { %2539 = vrsqrt.f32 %v1782_v13 }
 0xec5   : > { %v2540_v14 = vpop.eup %2539 }
 0xec6   : > { %v1784_v16 = vmul.f32 %v2540_v14, %v1776_v7 }
 0xec8   : > { %v1791_v20 = vmul.f32 %v2295_v15, %v1784_v16 }
 0xeca   : > { %v1798_v21 = vadd.f32 %v2296_v18, %v1791_v20 }
 0xecc   : > { %v1799_v22 = vpack.c.bf16 %v1798_v21, %v1798_v21 }
 0xece   : > { %2435 = vmatmul.mubr.msk.bf16.vlgmr.msra.gmra.mrb[20].mxu0 %vm853_vm2, %v1799_v22 }
 0xecf   : > { %2451 = vmatpush3.bf16.msra.mxu0 (!%p2309_p8), %v2545_v0  ;;  %2454 = vmatprep.mubr.msk.bf16.mxu0 (!%p2309_p8), %vm2601_vm6, %v2600_v1 }
 0xed0   : > { %2452 = vmatprep.subr.bf16.mxu0 (!%p2309_p8), %v2600_v1 }
 0xed3   : > { %2453 = vmatpush3.bf16.msra.mxu0 (!%p2309_p8), %v2546_v2 }
 0xfa1   : > { %v1860_v31 = vpop.f32.mrb[20].mxu0 }
 0xfa2   : > { %v1861_v32 = vadd.f32 %v2297_v28, %v1860_v31  ;;  %v2436_v33 = vpop.f32.mrb[21].mxu0 }
 0xfa3   : > { %v1863_v29 = vpop.f32.mrb[22].mxu0 }
 0xfa4   : > { %v1867_v34 = vmul.f32 0.044715, %v1861_v32  ;;  %v2437_v35 = vpop.f32.mrb[23].mxu0  ;;  %v1866_v17 = vmul.f32 0.5, %v1861_v32 }
 0xfa6   : > { %v1868_v36 = vmul.f32 %v1867_v34, %v1861_v32 }
 0xfa8   : > { %v1869_v37 = vmul.f32 %v1868_v36, %v1861_v32 }
 0xfaa   : > { %v1870_v38 = vadd.f32 %v1869_v37, %v1861_v32 }
 0xfac   : > { %v1871_v39 = vmul.f32 0.7978846, %v1870_v38 }
 0xfae   : > { %2541 = vtanh.f32 %v1871_v39 }
 0xfb8   : > { %v2542_v40 = vpop.eup %2541 }
 0xfb9   : > { %v1873_v41 = vadd.f32 1.0, %v2542_v40 }
 0xfbb   : > { %v1874_v42 = vmul.f32 %v1873_v41, %v1866_v17 }
 0xfbd   : > { %v1875_v43 = vpack.c.bf16 %v1874_v42, %v1874_v42 }
 0xfbf   : > { %2447 = vmatmul.mubr.msk.bf16.vlgmr.msra.gmra.mrb[20].mxu1 %vm1915_vm5, %v1875_v43 }
0x1092   : > { %v1953_v45 = vpop.f32.mrb[20].mxu1 }
0x1093   : > { %v1954_v46 = vadd.f32 %v2301_v44, %v1953_v45  ;;  %v2448_v47 = vpop.f32.mrb[21].mxu1 }
0x1094   : > { %v1956_v48 = vpop.f32.mrb[22].mxu1 }
0x1095   : > { %v2449_v49 = vpop.f32.mrb[23].mxu1  ;;  %v1959_v50 = vadd.f32 %v1954_v46, %v1798_v21 }
0x1097   : > { %v1962_v30 = vsel %vm853_vm2, %v1959_v50, 0.0 }
0x1098   : > { %1963 = vadd.xlane.f32.xlu1 %v1962_v30 }
0x1125   : > { %v1964_v51 = vpop.xlane.xlu1 %1963 }
0x1126   : > { %v1965_v52 = vmul.f32 0.03125, %v1964_v51 }
0x1128   : > { %v1966_v53 = vsub.f32 %v1959_v50, %v1965_v52 }
0x112a   : > { %v1967_v54 = vmul.f32 %v1966_v53, %v1966_v53 }
0x112c   : > { %v1968_v55 = vsel %vm853_vm2, %v1967_v54, 0.0 }
0x112d   : > { %1969 = vadd.xlane.f32.xlu1 %v1968_v55 }
0x11ba   : > { %v1970_v23 = vpop.xlane.xlu1 %1969 }
0x11bb   : > { %v1971_v56 = vmul.f32 0.03125, %v1970_v23 }
0x11bd   : > { %v1972_v57 = vadd.f32 1e-05, %v1971_v56 }
0x11bf   : > { %2543 = vrsqrt.f32 %v1972_v57 }
0x11c9   : > { %v2544_v58 = vpop.eup %2543 }
0x11ca   : > { %v1974_v60 = vmul.f32 %v2544_v58, %v1966_v53  ;;  %1993 = sbr.rel (%p2309_p8) target bundleno = 4777 (0x12a9), region = 100 }
0x11cc   : > { %v1981_v62 = vmul.f32 %v2307_v59, %v1974_v60 }
0x11ce   : > { %v1988_v63 = vadd.f32 %v2308_v61, %v1981_v62 }
0x11d0   : > { %1989 = vst.msk [vmem:[#allocation2] sm:$0xff] %vm853_vm2, %v1988_v63  ;;  %v1994_v3 = vpack.c.bf16 (!%p2309_p8), %v1988_v63, %v1988_v63 }
0x11d2   : > { %2455 = vmatmul.mubr.msk.bf16.vlgmr.msra.gmra.mrb[0].mxu0 %vm853_vm2, %v1994_v3 }
0x12a5   : > { %v2055_v5 = vpop.f32.mrb[0].mxu0 }
0x12a6   : > { %v2056_v6 = vadd.f32 %v2310_v4, %v2055_v5  ;;  %v2456_v7 = vpop.f32.mrb[1].mxu0 }
0x12a7   : > { %v2058_v8 = vpop.f32.mrb[2].mxu0 }
0x12a8   : > { %2061 = vst [vmem:[%s2800_s11] sm:$0xff] %v2056_v6  ;;  %v2457_v9 = vpop.f32.mrb[3].mxu0 }
0x12a9 PF: > { %s3077_s18 = sld [smem:[#allocation6_spill]]  ;;  %s3078_s27 = sld [smem:[#allocation4_spill]] }
0x12aa   : > { %s3079_s28 = sld [smem:[#allocation5_spill]]  ;;  %s3080_s29 = sld [smem:[#allocation7_spill]] }
0x12ab   : > { %s3081_s30 = sld [smem:[#allocation8_spill]] }
0x12af   : > { %s28_s0 = sadd.s32 1, %s3077_s18  }
0x12b0   : > { %p25_p9 = scmp.ge.s32.totalorder %s28_s0, 6  }
0x12b2   :  { %27 = sbr.rel (!%p25_p9) target bundleno = 13 (0xd), region = 169 }

</bundles_post_ra>
